<compile_context>
chip_gen: v7x
topology: tpu7x:2x2x1
jax: 0.10.0
libtpu: 0.0.40
codegen_flags: <defaults>
</compile_context>

<pallas_src>
import functools
import math

import jax
import jax.numpy as jnp
from jax import lax
from jax.experimental import pallas as pl
from jax.experimental.pallas import tpu as pltpu

# Small synthetic BERT config (stands in for bert-base-uncased: 768 -> 32 etc.)
CFG = dict(
    vocab=64, type_vocab=2, max_pos=16,
    hidden=32, heads=4, head_dim=8, intermediate=64,
    layers=2, eps=1e-12,
)

# Inter-kernel activation dtype / MXU input dtype (accumulation is always f32).
ACT_DTYPE = jnp.bfloat16
# TODO(synk): optional fp8 weight path for v7x (bf16 act x fp8 weight) not
# implemented; bf16 weights are used on all generations.


def _vmem_limit_bytes():
    try:
        cap = pltpu.get_tpu_info().vmem_capacity_bytes
        return int(cap * 3 // 4)
    except Exception:
        return 48 << 20          # conservative default (fits v7x's 64 MiB)


_VMEM_LIMIT = _vmem_limit_bytes()
TM_PREF = 512
TN_PREF = 512
TK_PREF = 1024                   # full-K blocks for H=768; K=3072 -> 3 steps


def _pick_tile(dim, pref, align):
    """Largest tile <= pref that divides dim and is a multiple of `align`.
    Falls back to the full dimension (a full-extent block is always legal)."""
    if dim <= pref:
        return dim
    t = (pref // align) * align
    while t >= align:
        if dim % t == 0:
            return t
        t -= align
    return dim


def _lane_tile(dim, pref):
    # 256-aligned tiles keep every MXU pass full on v6e/v7x (256-wide MXU);
    # 256-multiples are also 128-multiples so v5e is unaffected.
    align = 256 if dim % 256 == 0 else 128
    return _pick_tile(dim, pref, align)


def _cparams(*semantics):
    kw = dict(vmem_limit_bytes=_VMEM_LIMIT)
    if semantics:
        kw["dimension_semantics"] = semantics
    return pltpu.CompilerParams(**kw)


# ----------------------------- Pallas kernels ------------------------------

def _dense_fullk_kernel(x_ref, w_ref, b_ref, o_ref, *, activation):
    y = jnp.dot(x_ref[...], w_ref[...],
                preferred_element_type=jnp.float32) + b_ref[...]
    if activation == "gelu":
        # TODO(synk): HF BERT uses exact erf-GELU; tanh approximation used
        # here to stay within guaranteed Mosaic lowerings.
        y = jax.nn.gelu(y, approximate=True)
    o_ref[...] = y.astype(o_ref.dtype)


def _dense_acc_kernel(x_ref, w_ref, b_ref, o_ref, acc_ref, *, activation):
    k = pl.program_id(2)

    @pl.when(k == 0)
    def _():
        acc_ref[...] = jnp.zeros_like(acc_ref)

    acc_ref[...] += jnp.dot(x_ref[...], w_ref[...],
                            preferred_element_type=jnp.float32)

    @pl.when(k == pl.num_programs(2) - 1)
    def _():
        y = acc_ref[...] + b_ref[...]
        if activation == "gelu":
            y = jax.nn.gelu(y, approximate=True)
        o_ref[...] = y.astype(o_ref.dtype)


def dense(x, w, b, activation=None):
    """y = act(x @ w + b); full-K single-step kernel when K fits a block,
    otherwise (M,N,K) grid with an f32 VMEM accumulator."""
    M, K = x.shape
    _, N = w.shape
    if x.dtype != ACT_DTYPE:
        x = x.astype(ACT_DTYPE)
    if w.dtype != ACT_DTYPE:
        w = w.astype(ACT_DTYPE)
    tm = _pick_tile(M, TM_PREF, 8)
    tn = _lane_tile(N, TN_PREF)
    tk = _lane_tile(K, TK_PREF)
    # Keep at least 2 blocks along a parallel axis (v7x has 2 TensorCores).
    if (M // tm) * (N // tn) == 1 and M >= 16:
        tm = _pick_tile(M, max(8, M // 2), 8)
    nk = K // tk

    if nk == 1:
        return pl.pallas_call(
            functools.partial(_dense_fullk_kernel, activation=activation),
            out_shape=jax.ShapeDtypeStruct((M, N), ACT_DTYPE),
            grid=(M // tm, N // tn),
            in_specs=[pl.BlockSpec((tm, K), lambda i, j: (i, 0)),
                      pl.BlockSpec((K, tn), lambda i, j: (0, j)),
                      pl.BlockSpec((1, tn), lambda i, j: (0, j))],
            out_specs=pl.BlockSpec((tm, tn), lambda i, j: (i, j)),
            compiler_params=_cparams("parallel", "parallel"),
        )(x, w, b)

    return pl.pallas_call(
        functools.partial(_dense_acc_kernel, activation=activation),
        out_shape=jax.ShapeDtypeStruct((M, N), ACT_DTYPE),
        grid=(M // tm, N // tn, nk),
        in_specs=[pl.BlockSpec((tm, tk), lambda i, j, k: (i, k)),
                  pl.BlockSpec((tk, tn), lambda i, j, k: (k, j)),
                  pl.BlockSpec((1, tn), lambda i, j, k: (0, j))],
        out_specs=pl.BlockSpec((tm, tn), lambda i, j, k: (i, j)),
        scratch_shapes=[pltpu.VMEM((tm, tn), jnp.float32)],
        compiler_params=_cparams("parallel", "parallel", "arbitrary"),
    )(x, w, b)


def _dense_res_ln_fullk_kernel(x_ref, w_ref, b_ref, r_ref, g_ref, bt_ref,
                               o_ref, *, eps):
    y = (jnp.dot(x_ref[...], w_ref[...], preferred_element_type=jnp.float32)
         + b_ref[...] + r_ref[...].astype(jnp.float32))
    mean = jnp.mean(y, axis=-1, keepdims=True)
    var = jnp.mean(jnp.square(y - mean), axis=-1, keepdims=True)
    yn = (y - mean) * lax.rsqrt(var + eps)
    o_ref[...] = (yn * g_ref[...] + bt_ref[...]).astype(o_ref.dtype)


def _dense_res_ln_acc_kernel(x_ref, w_ref, b_ref, r_ref, g_ref, bt_ref,
                             o_ref, acc_ref, *, eps):
    k = pl.program_id(1)

    @pl.when(k == 0)
    def _():
        acc_ref[...] = jnp.zeros_like(acc_ref)

    acc_ref[...] += jnp.dot(x_ref[...], w_ref[...],
                            preferred_element_type=jnp.float32)

    @pl.when(k == pl.num_programs(1) - 1)
    def _():
        y = acc_ref[...] + b_ref[...] + r_ref[...].astype(jnp.float32)
        mean = jnp.mean(y, axis=-1, keepdims=True)
        var = jnp.mean(jnp.square(y - mean), axis=-1, keepdims=True)
        yn = (y - mean) * lax.rsqrt(var + eps)
        o_ref[...] = (yn * g_ref[...] + bt_ref[...]).astype(o_ref.dtype)


def dense_res_ln(x, w, b, res, g, beta, eps):
    """LayerNorm((x @ w + b) + res), fused.  N is kept un-tiled (full row
    needed for the LN statistics); K is accumulated over the grid only when
    it does not fit a single block."""
    M, K = x.shape
    _, N = w.shape
    if x.dtype != ACT_DTYPE:
        x = x.astype(ACT_DTYPE)
    if w.dtype != ACT_DTYPE:
        w = w.astype(ACT_DTYPE)
    tm = _pick_tile(M, TM_PREF, 8)
    if M // tm == 1 and M >= 16:          # only parallel axis here is M
        tm = _pick_tile(M, max(8, M // 2), 8)
    tk = _lane_tile(K, TK_PREF)
    nk = K // tk

    if nk == 1:
        return pl.pallas_call(
            functools.partial(_dense_res_ln_fullk_kernel, eps=eps),
            out_shape=jax.ShapeDtypeStruct((M, N), ACT_DTYPE),
            grid=(M // tm,),
            in_specs=[pl.BlockSpec((tm, K), lambda i: (i, 0)),
                      pl.BlockSpec((K, N), lambda i: (0, 0)),
                      pl.BlockSpec((1, N), lambda i: (0, 0)),
                      pl.BlockSpec((tm, N), lambda i: (i, 0)),
                      pl.BlockSpec((1, N), lambda i: (0, 0)),
                      pl.BlockSpec((1, N), lambda i: (0, 0))],
            out_specs=pl.BlockSpec((tm, N), lambda i: (i, 0)),
            compiler_params=_cparams("parallel"),
        )(x, w, b, res, g, beta)

    return pl.pallas_call(
        functools.partial(_dense_res_ln_acc_kernel, eps=eps),
        out_shape=jax.ShapeDtypeStruct((M, N), ACT_DTYPE),
        grid=(M // tm, nk),
        in_specs=[pl.BlockSpec((tm, tk), lambda i, k: (i, k)),
                  pl.BlockSpec((tk, N), lambda i, k: (k, 0)),
                  pl.BlockSpec((1, N), lambda i, k: (0, 0)),
                  pl.BlockSpec((tm, N), lambda i, k: (i, 0)),
                  pl.BlockSpec((1, N), lambda i, k: (0, 0)),
                  pl.BlockSpec((1, N), lambda i, k: (0, 0))],
        out_specs=pl.BlockSpec((tm, N), lambda i, k: (i, 0)),
        scratch_shapes=[pltpu.VMEM((tm, N), jnp.float32)],
        compiler_params=_cparams("parallel", "arbitrary"),
    )(x, w, b, res, g, beta)


def _layernorm_kernel(x_ref, g_ref, b_ref, o_ref, *, eps):
    x = x_ref[...].astype(jnp.float32)
    mean = jnp.mean(x, axis=-1, keepdims=True)
    var = jnp.mean(jnp.square(x - mean), axis=-1, keepdims=True)
    y = (x - mean) * lax.rsqrt(var + eps)
    o_ref[...] = (y * g_ref[...] + b_ref[...]).astype(o_ref.dtype)


def layernorm(x, g, b, eps):
    M, H = x.shape
    tm = _pick_tile(M, TM_PREF, 8)
    if M // tm == 1 and M >= 16:
        tm = _pick_tile(M, max(8, M // 2), 8)
    return pl.pallas_call(
        functools.partial(_layernorm_kernel, eps=eps),
        out_shape=jax.ShapeDtypeStruct((M, H), ACT_DTYPE),
        grid=(M // tm,),
        in_specs=[pl.BlockSpec((tm, H), lambda i: (i, 0)),
                  pl.BlockSpec((1, H), lambda i: (0, 0)),
                  pl.BlockSpec((1, H), lambda i: (0, 0))],
        out_specs=pl.BlockSpec((tm, H), lambda i: (i, 0)),
        compiler_params=_cparams("parallel"),
    )(x, g, b)


def _attention_kernel(q_ref, k_ref, v_ref, bias_ref, o_ref, *,
                      heads, head_dim, scale, q_off, k_off, v_off):
    """One (batch, head-group) grid step.  q_ref/k_ref/v_ref are lane-group
    views of the fused [B, S, 3H] Q/K/V tensor (or the full tensor with static
    offsets when no 128-lane head group exists)."""
    bias = bias_ref[0]                              # [1, S] f32
    W = heads * head_dim
    # Fold 1/sqrt(d) into q: S*W multiplies instead of S*S per head.
    qg = (q_ref[0, :, q_off:q_off + W].astype(jnp.float32)
          * scale).astype(ACT_DTYPE)                # [S, W]
    kg = k_ref[0, :, k_off:k_off + W]
    vg = v_ref[0, :, v_off:v_off + W]
    outs = []
    for h in range(heads):                          # heads in this group only
        lo = h * head_dim
        q = qg[:, lo:lo + head_dim]
        k = kg[:, lo:lo + head_dim]
        v = vg[:, lo:lo + head_dim]
        # Contract on the head dim of both operands: no transposed copy of K.
        s = lax.dot_general(q, k, (((1,), (1,)), ((), ())),
                            preferred_element_type=jnp.float32)
        s = s + bias
        m = jnp.max(s, axis=-1, keepdims=True)
        e = jnp.exp(s - m)
        p = e * pl.reciprocal(jnp.sum(e, axis=-1, keepdims=True),
                              approx=True)          # EUP divide
        outs.append(jnp.dot(p.astype(v.dtype), v,
                            preferred_element_type=jnp.float32))
    ctx = outs[0] if heads == 1 else jnp.concatenate(outs, axis=-1)
    # Single lane-dense [S, group_width] store per grid step.
    o_ref[0] = ctx.astype(o_ref.dtype)


def attention(qkv, bias, n_heads, head_dim):
    """Multi-head self-attention on the fused [B, S, 3H] Q/K/V tensor,
    gridded over (batch, 128-lane head group)."""
    B, S, H3 = qkv.shape
    H = H3 // 3
    scale = 1.0 / math.sqrt(head_dim)

    # Smallest head group whose lane width is a multiple of 128
    # (head pairs for BERT-base head_dim=64).
    hpg = None
    for g in range(1, n_heads + 1):
        if n_heads % g == 0 and (g * head_dim) % 128 == 0:
            hpg = g
            break

    if hpg is not None:
        n_groups = n_heads // hpg
        wg = hpg * head_dim
        in_blk = (1, S, wg)
        qmap = lambda b, g: (b, 0, g)
        kmap = lambda b, g, ng=n_groups: (b, 0, ng + g)
        vmap_ = lambda b, g, ng=n_groups: (b, 0, 2 * ng + g)
        offs = (0, 0, 0)
        heads_in_block = hpg
    else:
        # Tiny-config fallback: one full-width group per batch element.
        n_groups = 1
        wg = H
        in_blk = (1, S, H3)
        qmap = kmap = vmap_ = lambda b, g: (b, 0, 0)
        offs = (0, H, 2 * H)
        heads_in_block = n_heads

    # TODO(synk): for very long sequences, add a query-axis grid with online
    # softmax; at BERT-base S=512 the per-head [S,S] score tile fits VMEM.
    return pl.pallas_call(
        functools.partial(_attention_kernel, heads=heads_in_block,
                          head_dim=head_dim, scale=scale,
                          q_off=offs[0], k_off=offs[1], v_off=offs[2]),
        out_shape=jax.ShapeDtypeStruct((B, S, H), ACT_DTYPE),
        grid=(B, n_groups),
        in_specs=[pl.BlockSpec(in_blk, qmap),
                  pl.BlockSpec(in_blk, kmap),
                  pl.BlockSpec(in_blk, vmap_),
                  pl.BlockSpec((1, 1, S), lambda b, g: (b, 0, 0))],
        out_specs=pl.BlockSpec((1, S, wg), lambda b, g: (b, 0, g)),
        compiler_params=_cparams("parallel", "parallel"),
    )(qkv, qkv, qkv, bias)


def _pool_head_kernel(x_ref, w_ref, b_ref, out_ref):
    b = pl.program_id(0)
    x = x_ref[0].astype(jnp.float32)               # [S, H]
    H = x.shape[-1]
    apool = jnp.mean(x, axis=0, keepdims=True)     # torch.mean(o1, 1)
    mpool = jnp.max(x, axis=0, keepdims=True)      # torch.max(o1, 1).values
    w = w_ref[...]                                 # [1, 2H] (transposed Linear W)
    # cat((apool, mpool), 1) @ W + b as VPU reductions (avoids N=1 matmuls).
    # TODO(synk): nn.Dropout(0.3) on the concat is identity in eval mode.
    y = (jnp.sum(apool * w[:, :H], axis=-1, keepdims=True)
         + jnp.sum(mpool * w[:, H:], axis=-1, keepdims=True)
         + b_ref[...])
    out_ref[pl.ds(b, 1), :] = y.astype(out_ref.dtype)


def pool_head(o1, w_t, b):
    """Pool + Linear(2H, 1), gridded over batch so the per-step working set
    stays small at production shapes; the tiny (B,1) output stays resident."""
    B, S, H = o1.shape
    return pl.pallas_call(
        _pool_head_kernel,
        out_shape=jax.ShapeDtypeStruct((B, 1), jnp.float32),
        grid=(B,),
        in_specs=[pl.BlockSpec((1, S, H), lambda i: (i, 0, 0)),
                  pl.BlockSpec((1, 2 * H), lambda i: (0, 0)),
                  pl.BlockSpec((1, 1), lambda i: (0, 0))],
        out_specs=pl.BlockSpec((B, 1), lambda i: (0, 0)),
        compiler_params=_cparams("arbitrary"),
    )(o1, w_t, b)


# ------------------------------ model glue ---------------------------------

def init_params(key, cfg):
    H, I = cfg["hidden"], cfg["intermediate"]
    ks = iter(jax.random.split(key, 8 + cfg["layers"] * 8))

    def nrm(shape, dtype=jnp.float32):
        return (0.02 * jax.random.normal(next(ks), shape, jnp.float32)).astype(dtype)

    params = dict(
        word_emb=nrm((cfg["vocab"], H)),
        pos_emb=nrm((cfg["max_pos"], H)),
        type_emb=nrm((cfg["type_vocab"], H)),
        emb_ln_g=jnp.ones((1, H), jnp.float32),
        emb_ln_b=jnp.zeros((1, H), jnp.float32),
        out_w=nrm((2 * H, 1)),                 # nn.Linear(768*2, 1), stored [in, out]
        out_b=jnp.zeros((1, 1), jnp.float32),
        layers=[],
    )
    for _ in range(cfg["layers"]):
        params["layers"].append(dict(
            # Matmul weights stored in bf16 once (no per-forward cast / HBM pass).
            wqkv=nrm((H, 3 * H), ACT_DTYPE), bqkv=jnp.zeros((1, 3 * H), jnp.float32),
            wo=nrm((H, H), ACT_DTYPE), bo=jnp.zeros((1, H), jnp.float32),
            ln1_g=jnp.ones((1, H), jnp.float32), ln1_b=jnp.zeros((1, H), jnp.float32),
            wi=nrm((H, I), ACT_DTYPE), bi=jnp.zeros((1, I), jnp.float32),
            wo2=nrm((I, H), ACT_DTYPE), bo2=jnp.zeros((1, H), jnp.float32),
            ln2_g=jnp.ones((1, H), jnp.float32), ln2_b=jnp.zeros((1, H), jnp.float32),
        ))
    return params


def bert_layer(x, bias, p, cfg, B, S):
    """x: [B*S, H] bf16 activations (lane-dense)."""
    H = cfg["hidden"]
    qkv = dense(x, p["wqkv"], p["bqkv"])                        # [M, 3H]
    ctx = attention(qkv.reshape(B, S, 3 * H), bias,
                    cfg["heads"], cfg["head_dim"])              # [B, S, H]
    # attention-output dense -> +residual -> LayerNorm, fused.
    x1 = dense_res_ln(ctx.reshape(B * S, H), p["wo"], p["bo"], x,
                      p["ln1_g"], p["ln1_b"], cfg["eps"])
    inter = dense(x1, p["wi"], p["bi"], activation="gelu")      # [M, I]
    # FFN-output dense -> +residual -> LayerNorm, fused.
    x2 = dense_res_ln(inter, p["wo2"], p["bo2"], x1,
                      p["ln2_g"], p["ln2_b"], cfg["eps"])
    return x2


def forward(params, ids, mask, token_type_ids, cfg=CFG):
    B, S = ids.shape
    H = cfg["hidden"]
    pos = jnp.arange(S, dtype=jnp.int32)[None, :]
    # Embedding gathers are glue (data-dependent gather done in plain JAX).
    emb = (params["word_emb"][ids]
           + params["pos_emb"][pos]
           + params["type_emb"][token_type_ids])
    x = layernorm(emb.reshape(B * S, H), params["emb_ln_g"],
                  params["emb_ln_b"], cfg["eps"])                # [M, H] bf16
    # TODO(synk): embedding/hidden dropouts and bert_drop(0.3) are identity in eval.
    # HF BERT additive attention mask, hoisted out of the attention kernel.
    bias = ((1.0 - mask.astype(jnp.float32)) * -10000.0).reshape(B, 1, S)
    for layer_params in params["layers"]:
        x = bert_layer(x, bias, layer_params, cfg, B, S)
    # o1 = sequence output; apool/mpool/concat/Linear fused in one Pallas kernel.
    return pool_head(x.reshape(B, S, H), params["out_w"].T, params["out_b"])


if __name__ == "__main__":
    key = jax.random.PRNGKey(0)
    pkey, ikey, tkey = jax.random.split(key, 3)
    params = init_params(pkey, CFG)

    B, S = 2, 8
    ids = jax.random.randint(ikey, (B, S), 0, CFG["vocab"], dtype=jnp.int32)
    token_type_ids = jax.random.randint(tkey, (B, S), 0, CFG["type_vocab"],
                                        dtype=jnp.int32)
    mask = jnp.ones((B, S), jnp.int32).at[1, 6:].set(0)   # pad last 2 tokens of ex. 1

    p2 = jax.jit(forward)(params, ids, mask, token_type_ids)
    p2 = jax.block_until_ready(p2)
    assert p2.shape == (B, 1) and p2.dtype == jnp.float32
    print("KERNEL_OK")
</pallas_src>

<mosaic_0001>
module attributes {stable_mosaic.version = 11 : i64} {
  func.func @_layernorm_kernel(%arg0: i32, %arg1: memref<8x32xf32, #tpu.memory_space<vmem>>, %arg2: memref<1x32xf32, #tpu.memory_space<vmem>>, %arg3: memref<1x32xf32, #tpu.memory_space<vmem>>, %arg4: memref<8x32xbf16, #tpu.memory_space<vmem>>) attributes {dimension_semantics = [#tpu.dimension_semantics<parallel>], iteration_bounds = array<i64: 2>, scalar_prefetch = 0 : i64, scratch_operands = 0 : i64, tpu.core_type = #tpu.core_type<tc>, window_params = [{transform_indices = @transform_0, window_bounds = array<i64: 8, 32>}, {pipeline_mode = #tpu.pipeline_mode<synchronous>, transform_indices = @transform_1, window_bounds = array<i64: 1, 32>}, {pipeline_mode = #tpu.pipeline_mode<synchronous>, transform_indices = @transform_2, window_bounds = array<i64: 1, 32>}, {transform_indices = @transform_3, window_bounds = array<i64: 8, 32>}]} {
    %c0 = arith.constant 0 : index
    %c0_0 = arith.constant 0 : index
    %0 = vector.load %arg1[%c0, %c0_0] : memref<8x32xf32, #tpu.memory_space<vmem>>, vector<8x32xf32>
    %cst = arith.constant dense<0.000000e+00> : vector<8xf32>
    %1 = vector.multi_reduction <add>, %0, %cst [1] : vector<8x32xf32> to vector<8xf32>
    %2 = vector.shape_cast %1 : vector<8xf32> to vector<8x1xf32>
    %cst_1 = arith.constant 3.200000e+01 : f32
    %3 = vector.broadcast %cst_1 : f32 to vector<8x1xf32>
    %4 = arith.divf %2, %3 : vector<8x1xf32>
    %5 = vector.broadcast %4 : vector<8x1xf32> to vector<8x32xf32>
    %6 = arith.subf %0, %5 : vector<8x32xf32>
    %7 = arith.mulf %6, %6 : vector<8x32xf32>
    %cst_2 = arith.constant dense<0.000000e+00> : vector<8xf32>
    %8 = vector.multi_reduction <add>, %7, %cst_2 [1] : vector<8x32xf32> to vector<8xf32>
    %9 = vector.shape_cast %8 : vector<8xf32> to vector<8x1xf32>
    %cst_3 = arith.constant 3.200000e+01 : f32
    %10 = vector.broadcast %cst_3 : f32 to vector<8x1xf32>
    %11 = arith.divf %9, %10 : vector<8x1xf32>
    %12 = vector.broadcast %4 : vector<8x1xf32> to vector<8x32xf32>
    %13 = arith.subf %0, %12 : vector<8x32xf32>
    %cst_4 = arith.constant 9.99999996E-13 : f32
    %14 = vector.broadcast %cst_4 : f32 to vector<8x1xf32>
    %15 = arith.addf %11, %14 : vector<8x1xf32>
    %16 = math.rsqrt %15 : vector<8x1xf32>
    %17 = vector.broadcast %16 : vector<8x1xf32> to vector<8x32xf32>
    %18 = arith.mulf %13, %17 : vector<8x32xf32>
    %c0_5 = arith.constant 0 : index
    %c0_6 = arith.constant 0 : index
    %19 = vector.load %arg2[%c0_5, %c0_6] : memref<1x32xf32, #tpu.memory_space<vmem>>, vector<1x32xf32>
    %20 = vector.broadcast %19 : vector<1x32xf32> to vector<8x32xf32>
    %21 = arith.mulf %18, %20 : vector<8x32xf32>
    %c0_7 = arith.constant 0 : index
    %c0_8 = arith.constant 0 : index
    %22 = vector.load %arg3[%c0_7, %c0_8] : memref<1x32xf32, #tpu.memory_space<vmem>>, vector<1x32xf32>
    %23 = vector.broadcast %22 : vector<1x32xf32> to vector<8x32xf32>
    %24 = arith.addf %21, %23 : vector<8x32xf32>
    %25 = arith.truncf %24 : vector<8x32xf32> to vector<8x32xbf16>
    %c0_9 = arith.constant 0 : index
    %c0_10 = arith.constant 0 : index
    %26 = vector.load %arg4[%c0_9, %c0_10] : memref<8x32xbf16, #tpu.memory_space<vmem>>, vector<8x32xbf16>
    tpu.vector_store %arg4[%c0_9, %c0_10], %25 {strides = array<i32>} : memref<8x32xbf16, #tpu.memory_space<vmem>>, vector<8x32xbf16>,
    return
  }
  func.func @transform_0(%arg0: i32) -> (i32, i32) {
    %c0_i32 = arith.constant 0 : i32
    %c0_i32_0 = arith.constant 0 : i32
    return %arg0, %c0_i32 : i32, i32
  }
  func.func @transform_1(%arg0: i32) -> (i32, i32) {
    %c0_i32 = arith.constant 0 : i32
    %c0_i32_0 = arith.constant 0 : i32
    %c0_i32_1 = arith.constant 0 : i32
    return %c0_i32, %c0_i32_0 : i32, i32
  }
  func.func @transform_2(%arg0: i32) -> (i32, i32) {
    %c0_i32 = arith.constant 0 : i32
    %c0_i32_0 = arith.constant 0 : i32
    %c0_i32_1 = arith.constant 0 : i32
    return %c0_i32, %c0_i32_0 : i32, i32
  }
  func.func @transform_3(%arg0: i32) -> (i32, i32) {
    %c0_i32 = arith.constant 0 : i32
    %c0_i32_0 = arith.constant 0 : i32
    return %arg0, %c0_i32 : i32, i32
  }
}

module attributes {stable_mosaic.version = 11 : i64} {
  func.func @_dense_fullk_kernel(%arg0: i32, %arg1: i32, %arg2: memref<8x32xbf16, #tpu.memory_space<vmem>>, %arg3: memref<32x96xbf16, #tpu.memory_space<vmem>>, %arg4: memref<1x96xf32, #tpu.memory_space<vmem>>, %arg5: memref<8x96xbf16, #tpu.memory_space<vmem>>) attributes {dimension_semantics = [#tpu.dimension_semantics<parallel>, #tpu.dimension_semantics<parallel>], iteration_bounds = array<i64: 2, 1>, scalar_prefetch = 0 : i64, scratch_operands = 0 : i64, tpu.core_type = #tpu.core_type<tc>, window_params = [{transform_indices = @transform_0, window_bounds = array<i64: 8, 32>}, {transform_indices = @transform_1, window_bounds = array<i64: 32, 96>}, {transform_indices = @transform_2, window_bounds = array<i64: 1, 96>}, {transform_indices = @transform_3, window_bounds = array<i64: 8, 96>}]} {
    %c0 = arith.constant 0 : index
    %c0_0 = arith.constant 0 : index
    %0 = vector.load %arg2[%c0, %c0_0] : memref<8x32xbf16, #tpu.memory_space<vmem>>, vector<8x32xbf16>
    %c0_1 = arith.constant 0 : index
    %c0_2 = arith.constant 0 : index
    %1 = vector.load %arg3[%c0_1, %c0_2] : memref<32x96xbf16, #tpu.memory_space<vmem>>, vector<32x96xbf16>
    %cst = arith.constant dense<0.000000e+00> : vector<8x96xf32>
    %2 = tpu.matmul %0, %1, %cst {dimension_numbers = #tpu.dot_dimension_numbers<[1], [0], [0], [1], [0, 0, 1, 1], [], []>} : vector<8x32xbf16>, vector<32x96xbf16>, vector<8x96xf32> -> vector<8x96xf32>
    %c0_3 = arith.constant 0 : index
    %c0_4 = arith.constant 0 : index
    %3 = vector.load %arg4[%c0_3, %c0_4] : memref<1x96xf32, #tpu.memory_space<vmem>>, vector<1x96xf32>
    %4 = vector.broadcast %3 : vector<1x96xf32> to vector<8x96xf32>
    %5 = arith.addf %2, %4 : vector<8x96xf32>
    %6 = arith.truncf %5 : vector<8x96xf32> to vector<8x96xbf16>
    %c0_5 = arith.constant 0 : index
    %c0_6 = arith.constant 0 : index
    %7 = vector.load %arg5[%c0_5, %c0_6] : memref<8x96xbf16, #tpu.memory_space<vmem>>, vector<8x96xbf16>
    tpu.vector_store %arg5[%c0_5, %c0_6], %6 {strides = array<i32>} : memref<8x96xbf16, #tpu.memory_space<vmem>>, vector<8x96xbf16>,
    return
  }
  func.func @transform_0(%arg0: i32, %arg1: i32) -> (i32, i32) {
    %c0_i32 = arith.constant 0 : i32
    %c0_i32_0 = arith.constant 0 : i32
    return %arg0, %c0_i32 : i32, i32
  }
  func.func @transform_1(%arg0: i32, %arg1: i32) -> (i32, i32) {
    %c0_i32 = arith.constant 0 : i32
    %c0_i32_0 = arith.constant 0 : i32
    return %c0_i32, %arg1 : i32, i32
  }
  func.func @transform_2(%arg0: i32, %arg1: i32) -> (i32, i32) {
    %c0_i32 = arith.constant 0 : i32
    %c0_i32_0 = arith.constant 0 : i32
    return %c0_i32, %arg1 : i32, i32
  }
  func.func @transform_3(%arg0: i32, %arg1: i32) -> (i32, i32) {
    %c0_i32 = arith.constant 0 : i32
    return %arg0, %arg1 : i32, i32
  }
}

module attributes {stable_mosaic.version = 11 : i64} {
  func.func @_dense_res_ln_fullk_kernel(%arg0: i32, %arg1: memref<8x32xbf16, #tpu.memory_space<vmem>>, %arg2: memref<32x32xbf16, #tpu.memory_space<vmem>>, %arg3: memref<1x32xf32, #tpu.memory_space<vmem>>, %arg4: memref<8x32xbf16, #tpu.memory_space<vmem>>, %arg5: memref<1x32xf32, #tpu.memory_space<vmem>>, %arg6: memref<1x32xf32, #tpu.memory_space<vmem>>, %arg7: memref<8x32xbf16, #tpu.memory_space<vmem>>) attributes {dimension_semantics = [#tpu.dimension_semantics<parallel>], iteration_bounds = array<i64: 2>, scalar_prefetch = 0 : i64, scratch_operands = 0 : i64, tpu.core_type = #tpu.core_type<tc>, window_params = [{transform_indices = @transform_0, window_bounds = array<i64: 8, 32>}, {pipeline_mode = #tpu.pipeline_mode<synchronous>, transform_indices = @transform_1, window_bounds = array<i64: 32, 32>}, {pipeline_mode = #tpu.pipeline_mode<synchronous>, transform_indices = @transform_2, window_bounds = array<i64: 1, 32>}, {transform_indices = @transform_3, window_bounds = array<i64: 8, 32>}, {pipeline_mode = #tpu.pipeline_mode<synchronous>, transform_indices = @transform_4, window_bounds = array<i64: 1, 32>}, {pipeline_mode = #tpu.pipeline_mode<synchronous>, transform_indices = @transform_5, window_bounds = array<i64: 1, 32>}, {transform_indices = @transform_6, window_bounds = array<i64: 8, 32>}]} {
    %c0 = arith.constant 0 : index
    %c0_0 = arith.constant 0 : index
    %0 = vector.load %arg1[%c0, %c0_0] : memref<8x32xbf16, #tpu.memory_space<vmem>>, vector<8x32xbf16>
    %c0_1 = arith.constant 0 : index
    %c0_2 = arith.constant 0 : index
    %1 = vector.load %arg2[%c0_1, %c0_2] : memref<32x32xbf16, #tpu.memory_space<vmem>>, vector<32x32xbf16>
    %cst = arith.constant dense<0.000000e+00> : vector<8x32xf32>
    %2 = tpu.matmul %0, %1, %cst {dimension_numbers = #tpu.dot_dimension_numbers<[1], [0], [0], [1], [0, 0, 1, 1], [], []>} : vector<8x32xbf16>, vector<32x32xbf16>, vector<8x32xf32> -> vector<8x32xf32>
    %c0_3 = arith.constant 0 : index
    %c0_4 = arith.constant 0 : index
    %3 = vector.load %arg3[%c0_3, %c0_4] : memref<1x32xf32, #tpu.memory_space<vmem>>, vector<1x32xf32>
    %4 = vector.broadcast %3 : vector<1x32xf32> to vector<8x32xf32>
    %5 = arith.addf %2, %4 : vector<8x32xf32>
    %c0_5 = arith.constant 0 : index
    %c0_6 = arith.constant 0 : index
    %6 = vector.load %arg4[%c0_5, %c0_6] : memref<8x32xbf16, #tpu.memory_space<vmem>>, vector<8x32xbf16>
    %7 = arith.extf %6 : vector<8x32xbf16> to vector<8x32xf32>
    %8 = arith.addf %5, %7 : vector<8x32xf32>
    %cst_7 = arith.constant dense<0.000000e+00> : vector<8xf32>
    %9 = vector.multi_reduction <add>, %8, %cst_7 [1] : vector<8x32xf32> to vector<8xf32>
    %10 = vector.shape_cast %9 : vector<8xf32> to vector<8x1xf32>
    %cst_8 = arith.constant 3.200000e+01 : f32
    %11 = vector.broadcast %cst_8 : f32 to vector<8x1xf32>
    %12 = arith.divf %10, %11 : vector<8x1xf32>
    %13 = vector.broadcast %12 : vector<8x1xf32> to vector<8x32xf32>
    %14 = arith.subf %8, %13 : vector<8x32xf32>
    %15 = arith.mulf %14, %14 : vector<8x32xf32>
    %cst_9 = arith.constant dense<0.000000e+00> : vector<8xf32>
    %16 = vector.multi_reduction <add>, %15, %cst_9 [1] : vector<8x32xf32> to vector<8xf32>
    %17 = vector.shape_cast %16 : vector<8xf32> to vector<8x1xf32>
    %cst_10 = arith.constant 3.200000e+01 : f32
    %18 = vector.broadcast %cst_10 : f32 to vector<8x1xf32>
    %19 = arith.divf %17, %18 : vector<8x1xf32>
    %20 = vector.broadcast %12 : vector<8x1xf32> to vector<8x32xf32>
    %21 = arith.subf %8, %20 : vector<8x32xf32>
    %cst_11 = arith.constant 9.99999996E-13 : f32
    %22 = vector.broadcast %cst_11 : f32 to vector<8x1xf32>
    %23 = arith.addf %19, %22 : vector<8x1xf32>
    %24 = math.rsqrt %23 : vector<8x1xf32>
    %25 = vector.broadcast %24 : vector<8x1xf32> to vector<8x32xf32>
    %26 = arith.mulf %21, %25 : vector<8x32xf32>
    %c0_12 = arith.constant 0 : index
    %c0_13 = arith.constant 0 : index
    %27 = vector.load %arg5[%c0_12, %c0_13] : memref<1x32xf32, #tpu.memory_space<vmem>>, vector<1x32xf32>
    %28 = vector.broadcast %27 : vector<1x32xf32> to vector<8x32xf32>
    %29 = arith.mulf %26, %28 : vector<8x32xf32>
    %c0_14 = arith.constant 0 : index
    %c0_15 = arith.constant 0 : index
    %30 = vector.load %arg6[%c0_14, %c0_15] : memref<1x32xf32, #tpu.memory_space<vmem>>, vector<1x32xf32>
    %31 = vector.broadcast %30 : vector<1x32xf32> to vector<8x32xf32>
    %32 = arith.addf %29, %31 : vector<8x32xf32>
    %33 = arith.truncf %32 : vector<8x32xf32> to vector<8x32xbf16>
    %c0_16 = arith.constant 0 : index
    %c0_17 = arith.constant 0 : index
    %34 = vector.load %arg7[%c0_16, %c0_17] : memref<8x32xbf16, #tpu.memory_space<vmem>>, vector<8x32xbf16>
    tpu.vector_store %arg7[%c0_16, %c0_17], %33 {strides = array<i32>} : memref<8x32xbf16, #tpu.memory_space<vmem>>, vector<8x32xbf16>,
    return
  }
  func.func @transform_0(%arg0: i32) -> (i32, i32) {
    %c0_i32 = arith.constant 0 : i32
    %c0_i32_0 = arith.constant 0 : i32
    return %arg0, %c0_i32 : i32, i32
  }
  func.func @transform_1(%arg0: i32) -> (i32, i32) {
    %c0_i32 = arith.constant 0 : i32
    %c0_i32_0 = arith.constant 0 : i32
    %c0_i32_1 = arith.constant 0 : i32
    return %c0_i32, %c0_i32_0 : i32, i32
  }
  func.func @transform_2(%arg0: i32) -> (i32, i32) {
    %c0_i32 = arith.constant 0 : i32
    %c0_i32_0 = arith.constant 0 : i32
    %c0_i32_1 = arith.constant 0 : i32
    return %c0_i32, %c0_i32_0 : i32, i32
  }
  func.func @transform_3(%arg0: i32) -> (i32, i32) {
    %c0_i32 = arith.constant 0 : i32
    %c0_i32_0 = arith.constant 0 : i32
    return %arg0, %c0_i32 : i32, i32
  }
  func.func @transform_4(%arg0: i32) -> (i32, i32) {
    %c0_i32 = arith.constant 0 : i32
    %c0_i32_0 = arith.constant 0 : i32
    %c0_i32_1 = arith.constant 0 : i32
    return %c0_i32, %c0_i32_0 : i32, i32
  }
  func.func @transform_5(%arg0: i32) -> (i32, i32) {
    %c0_i32 = arith.constant 0 : i32
    %c0_i32_0 = arith.constant 0 : i32
    %c0_i32_1 = arith.constant 0 : i32
    return %c0_i32, %c0_i32_0 : i32, i32
  }
  func.func @transform_6(%arg0: i32) -> (i32, i32) {
    %c0_i32 = arith.constant 0 : i32
    %c0_i32_0 = arith.constant 0 : i32
    return %arg0, %c0_i32 : i32, i32
  }
}

module attributes {stable_mosaic.version = 11 : i64} {
  func.func @_attention_kernel(%arg0: i32, %arg1: i32, %arg2: memref<1x8x96xbf16, #tpu.memory_space<vmem>>, %arg3: memref<1x8x96xbf16, #tpu.memory_space<vmem>>, %arg4: memref<1x8x96xbf16, #tpu.memory_space<vmem>>, %arg5: memref<1x1x8xf32, #tpu.memory_space<vmem>>, %arg6: memref<1x8x32xbf16, #tpu.memory_space<vmem>>) attributes {dimension_semantics = [#tpu.dimension_semantics<parallel>, #tpu.dimension_semantics<parallel>], iteration_bounds = array<i64: 2, 1>, scalar_prefetch = 0 : i64, scratch_operands = 0 : i64, tpu.core_type = #tpu.core_type<tc>, window_params = [{transform_indices = @transform_0, window_bounds = array<i64: 1, 8, 96>}, {transform_indices = @transform_1, window_bounds = array<i64: 1, 8, 96>}, {transform_indices = @transform_2, window_bounds = array<i64: 1, 8, 96>}, {transform_indices = @transform_3, window_bounds = array<i64: 1, 1, 8>}, {transform_indices = @transform_4, window_bounds = array<i64: 1, 8, 32>}]} {
    %c0 = arith.constant 0 : index
    %c0_0 = arith.constant 0 : index
    %c0_1 = arith.constant 0 : index
    %0 = vector.load %arg5[%c0, %c0_0, %c0_1] : memref<1x1x8xf32, #tpu.memory_space<vmem>>, vector<1x1x8xf32>
    %1 = vector.shape_cast %0 : vector<1x1x8xf32> to vector<1x8xf32>
    %c0_2 = arith.constant 0 : index
    %c0_3 = arith.constant 0 : index
    %c0_4 = arith.constant 0 : index
    %2 = vector.load %arg2[%c0_2, %c0_3, %c0_4] : memref<1x8x96xbf16, #tpu.memory_space<vmem>>, vector<1x8x32xbf16>
    %3 = vector.shape_cast %2 : vector<1x8x32xbf16> to vector<8x32xbf16>
    %4 = arith.extf %3 : vector<8x32xbf16> to vector<8x32xf32>
    %cst = arith.constant 0.353553385 : f32
    %5 = vector.broadcast %cst : f32 to vector<8x32xf32>
    %6 = arith.mulf %4, %5 : vector<8x32xf32>
    %7 = arith.truncf %6 : vector<8x32xf32> to vector<8x32xbf16>
    %c0_5 = arith.constant 0 : index
    %c0_6 = arith.constant 0 : index
    %c32 = arith.constant 32 : index
    %8 = vector.load %arg3[%c0_5, %c0_6, %c32] : memref<1x8x96xbf16, #tpu.memory_space<vmem>>, vector<1x8x32xbf16>
    %9 = vector.shape_cast %8 : vector<1x8x32xbf16> to vector<8x32xbf16>
    %c0_7 = arith.constant 0 : index
    %c0_8 = arith.constant 0 : index
    %c64 = arith.constant 64 : index
    %10 = vector.load %arg4[%c0_7, %c0_8, %c64] : memref<1x8x96xbf16, #tpu.memory_space<vmem>>, vector<1x8x32xbf16>
    %11 = vector.shape_cast %10 : vector<1x8x32xbf16> to vector<8x32xbf16>
    %12 = vector.extract_strided_slice %7 {offsets = [0, 0], sizes = [8, 8], strides = [1, 1]} : vector<8x32xbf16> to vector<8x8xbf16>
    %13 = vector.extract_strided_slice %9 {offsets = [0, 0], sizes = [8, 8], strides = [1, 1]} : vector<8x32xbf16> to vector<8x8xbf16>
    %14 = vector.extract_strided_slice %11 {offsets = [0, 0], sizes = [8, 8], strides = [1, 1]} : vector<8x32xbf16> to vector<8x8xbf16>
    %cst_9 = arith.constant dense<0.000000e+00> : vector<8x8xf32>
    %15 = tpu.matmul %12, %13, %cst_9 {dimension_numbers = #tpu.dot_dimension_numbers<[1], [1], [0], [0], [0, 0, 1, 0], [], []>} : vector<8x8xbf16>, vector<8x8xbf16>, vector<8x8xf32> -> vector<8x8xf32>
    %16 = vector.broadcast %1 : vector<1x8xf32> to vector<8x8xf32>
    %17 = arith.addf %15, %16 : vector<8x8xf32>
    %cst_10 = arith.constant dense<0xFF800000> : vector<8xf32>
    %18 = vector.multi_reduction <maximumf>, %17, %cst_10 [1] : vector<8x8xf32> to vector<8xf32>
    %19 = vector.shape_cast %18 : vector<8xf32> to vector<8x1xf32>
    %20 = vector.broadcast %19 : vector<8x1xf32> to vector<8x8xf32>
    %21 = arith.subf %17, %20 : vector<8x8xf32>
    %22 = math.exp %21 : vector<8x8xf32>
    %cst_11 = arith.constant dense<0.000000e+00> : vector<8xf32>
    %23 = vector.multi_reduction <add>, %22, %cst_11 [1] : vector<8x8xf32> to vector<8xf32>
    %24 = vector.shape_cast %23 : vector<8xf32> to vector<8x1xf32>
    %25 = tpu.reciprocal %24 {approx = true} : vector<8x1xf32> -> vector<8x1xf32>
    %26 = vector.broadcast %25 : vector<8x1xf32> to vector<8x8xf32>
    %27 = arith.mulf %22, %26 : vector<8x8xf32>
    %28 = arith.truncf %27 : vector<8x8xf32> to vector<8x8xbf16>
    %cst_12 = arith.constant dense<0.000000e+00> : vector<8x8xf32>
    %29 = tpu.matmul %28, %14, %cst_12 {dimension_numbers = #tpu.dot_dimension_numbers<[1], [0], [0], [1], [0, 0, 1, 1], [], []>} : vector<8x8xbf16>, vector<8x8xbf16>, vector<8x8xf32> -> vector<8x8xf32>
    %30 = vector.extract_strided_slice %7 {offsets = [0, 8], sizes = [8, 8], strides = [1, 1]} : vector<8x32xbf16> to vector<8x8xbf16>
    %31 = vector.extract_strided_slice %9 {offsets = [0, 8], sizes = [8, 8], strides = [1, 1]} : vector<8x32xbf16> to vector<8x8xbf16>
    %32 = vector.extract_strided_slice %11 {offsets = [0, 8], sizes = [8, 8], strides = [1, 1]} : vector<8x32xbf16> to vector<8x8xbf16>
    %cst_13 = arith.constant dense<0.000000e+00> : vector<8x8xf32>
    %33 = tpu.matmul %30, %31, %cst_13 {dimension_numbers = #tpu.dot_dimension_numbers<[1], [1], [0], [0], [0, 0, 1, 0], [], []>} : vector<8x8xbf16>, vector<8x8xbf16>, vector<8x8xf32> -> vector<8x8xf32>
    %34 = vector.broadcast %1 : vector<1x8xf32> to vector<8x8xf32>
    %35 = arith.addf %33, %34 : vector<8x8xf32>
    %cst_14 = arith.constant dense<0xFF800000> : vector<8xf32>
    %36 = vector.multi_reduction <maximumf>, %35, %cst_14 [1] : vector<8x8xf32> to vector<8xf32>
    %37 = vector.shape_cast %36 : vector<8xf32> to vector<8x1xf32>
    %38 = vector.broadcast %37 : vector<8x1xf32> to vector<8x8xf32>
    %39 = arith.subf %35, %38 : vector<8x8xf32>
    %40 = math.exp %39 : vector<8x8xf32>
    %cst_15 = arith.constant dense<0.000000e+00> : vector<8xf32>
    %41 = vector.multi_reduction <add>, %40, %cst_15 [1] : vector<8x8xf32> to vector<8xf32>
    %42 = vector.shape_cast %41 : vector<8xf32> to vector<8x1xf32>
    %43 = tpu.reciprocal %42 {approx = true} : vector<8x1xf32> -> vector<8x1xf32>
    %44 = vector.broadcast %43 : vector<8x1xf32> to vector<8x8xf32>
    %45 = arith.mulf %40, %44 : vector<8x8xf32>
    %46 = arith.truncf %45 : vector<8x8xf32> to vector<8x8xbf16>
    %cst_16 = arith.constant dense<0.000000e+00> : vector<8x8xf32>
    %47 = tpu.matmul %46, %32, %cst_16 {dimension_numbers = #tpu.dot_dimension_numbers<[1], [0], [0], [1], [0, 0, 1, 1], [], []>} : vector<8x8xbf16>, vector<8x8xbf16>, vector<8x8xf32> -> vector<8x8xf32>
    %48 = vector.extract_strided_slice %7 {offsets = [0, 16], sizes = [8, 8], strides = [1, 1]} : vector<8x32xbf16> to vector<8x8xbf16>
    %49 = vector.extract_strided_slice %9 {offsets = [0, 16], sizes = [8, 8], strides = [1, 1]} : vector<8x32xbf16> to vector<8x8xbf16>
    %50 = vector.extract_strided_slice %11 {offsets = [0, 16], sizes = [8, 8], strides = [1, 1]} : vector<8x32xbf16> to vector<8x8xbf16>
    %cst_17 = arith.constant dense<0.000000e+00> : vector<8x8xf32>
    %51 = tpu.matmul %48, %49, %cst_17 {dimension_numbers = #tpu.dot_dimension_numbers<[1], [1], [0], [0], [0, 0, 1, 0], [], []>} : vector<8x8xbf16>, vector<8x8xbf16>, vector<8x8xf32> -> vector<8x8xf32>
    %52 = vector.broadcast %1 : vector<1x8xf32> to vector<8x8xf32>
    %53 = arith.addf %51, %52 : vector<8x8xf32>
    %cst_18 = arith.constant dense<0xFF800000> : vector<8xf32>
    %54 = vector.multi_reduction <maximumf>, %53, %cst_18 [1] : vector<8x8xf32> to vector<8xf32>
    %55 = vector.shape_cast %54 : vector<8xf32> to vector<8x1xf32>
    %56 = vector.broadcast %55 : vector<8x1xf32> to vector<8x8xf32>
    %57 = arith.subf %53, %56 : vector<8x8xf32>
    %58 = math.exp %57 : vector<8x8xf32>
    %cst_19 = arith.constant dense<0.000000e+00> : vector<8xf32>
    %59 = vector.multi_reduction <add>, %58, %cst_19 [1] : vector<8x8xf32> to vector<8xf32>
    %60 = vector.shape_cast %59 : vector<8xf32> to vector<8x1xf32>
    %61 = tpu.reciprocal %60 {approx = true} : vector<8x1xf32> -> vector<8x1xf32>
    %62 = vector.broadcast %61 : vector<8x1xf32> to vector<8x8xf32>
    %63 = arith.mulf %58, %62 : vector<8x8xf32>
    %64 = arith.truncf %63 : vector<8x8xf32> to vector<8x8xbf16>
    %cst_20 = arith.constant dense<0.000000e+00> : vector<8x8xf32>
    %65 = tpu.matmul %64, %50, %cst_20 {dimension_numbers = #tpu.dot_dimension_numbers<[1], [0], [0], [1], [0, 0, 1, 1], [], []>} : vector<8x8xbf16>, vector<8x8xbf16>, vector<8x8xf32> -> vector<8x8xf32>
    %66 = vector.extract_strided_slice %7 {offsets = [0, 24], sizes = [8, 8], strides = [1, 1]} : vector<8x32xbf16> to vector<8x8xbf16>
    %67 = vector.extract_strided_slice %9 {offsets = [0, 24], sizes = [8, 8], strides = [1, 1]} : vector<8x32xbf16> to vector<8x8xbf16>
    %68 = vector.extract_strided_slice %11 {offsets = [0, 24], sizes = [8, 8], strides = [1, 1]} : vector<8x32xbf16> to vector<8x8xbf16>
    %cst_21 = arith.constant dense<0.000000e+00> : vector<8x8xf32>
    %69 = tpu.matmul %66, %67, %cst_21 {dimension_numbers = #tpu.dot_dimension_numbers<[1], [1], [0], [0], [0, 0, 1, 0], [], []>} : vector<8x8xbf16>, vector<8x8xbf16>, vector<8x8xf32> -> vector<8x8xf32>
    %70 = vector.broadcast %1 : vector<1x8xf32> to vector<8x8xf32>
    %71 = arith.addf %69, %70 : vector<8x8xf32>
    %cst_22 = arith.constant dense<0xFF800000> : vector<8xf32>
    %72 = vector.multi_reduction <maximumf>, %71, %cst_22 [1] : vector<8x8xf32> to vector<8xf32>
    %73 = vector.shape_cast %72 : vector<8xf32> to vector<8x1xf32>
    %74 = vector.broadcast %73 : vector<8x1xf32> to vector<8x8xf32>
    %75 = arith.subf %71, %74 : vector<8x8xf32>
    %76 = math.exp %75 : vector<8x8xf32>
    %cst_23 = arith.constant dense<0.000000e+00> : vector<8xf32>
    %77 = vector.multi_reduction <add>, %76, %cst_23 [1] : vector<8x8xf32> to vector<8xf32>
    %78 = vector.shape_cast %77 : vector<8xf32> to vector<8x1xf32>
    %79 = tpu.reciprocal %78 {approx = true} : vector<8x1xf32> -> vector<8x1xf32>
    %80 = vector.broadcast %79 : vector<8x1xf32> to vector<8x8xf32>
    %81 = arith.mulf %76, %80 : vector<8x8xf32>
    %82 = arith.truncf %81 : vector<8x8xf32> to vector<8x8xbf16>
    %cst_24 = arith.constant dense<0.000000e+00> : vector<8x8xf32>
    %83 = tpu.matmul %82, %68, %cst_24 {dimension_numbers = #tpu.dot_dimension_numbers<[1], [0], [0], [1], [0, 0, 1, 1], [], []>} : vector<8x8xbf16>, vector<8x8xbf16>, vector<8x8xf32> -> vector<8x8xf32>
    %84 = tpu.concatenate %29, %47, %65, %83 in 1 : vector<8x8xf32>, vector<8x8xf32>, vector<8x8xf32>, vector<8x8xf32> -> vector<8x32xf32>
    %85 = arith.truncf %84 : vector<8x32xf32> to vector<8x32xbf16>
    %c0_25 = arith.constant 0 : index
    %c0_26 = arith.constant 0 : index
    %c0_27 = arith.constant 0 : index
    %86 = vector.load %arg6[%c0_25, %c0_26, %c0_27] : memref<1x8x32xbf16, #tpu.memory_space<vmem>>, vector<1x8x32xbf16>
    %87 = vector.shape_cast %86 : vector<1x8x32xbf16> to vector<8x32xbf16>
    %88 = vector.shape_cast %85 : vector<8x32xbf16> to vector<1x8x32xbf16>
    tpu.vector_store %arg6[%c0_25, %c0_26, %c0_27], %88 {strides = array<i32>} : memref<1x8x32xbf16, #tpu.memory_space<vmem>>, vector<1x8x32xbf16>,
    return
  }
  func.func @transform_0(%arg0: i32, %arg1: i32) -> (i32, i32, i32) {
    %c0_i32 = arith.constant 0 : i32
    %c0_i32_0 = arith.constant 0 : i32
    %c0_i32_1 = arith.constant 0 : i32
    return %arg0, %c0_i32, %c0_i32_0 : i32, i32, i32
  }
  func.func @transform_1(%arg0: i32, %arg1: i32) -> (i32, i32, i32) {
    %c0_i32 = arith.constant 0 : i32
    %c0_i32_0 = arith.constant 0 : i32
    %c0_i32_1 = arith.constant 0 : i32
    return %arg0, %c0_i32, %c0_i32_0 : i32, i32, i32
  }
  func.func @transform_2(%arg0: i32, %arg1: i32) -> (i32, i32, i32) {
    %c0_i32 = arith.constant 0 : i32
    %c0_i32_0 = arith.constant 0 : i32
    %c0_i32_1 = arith.constant 0 : i32
    return %arg0, %c0_i32, %c0_i32_0 : i32, i32, i32
  }
  func.func @transform_3(%arg0: i32, %arg1: i32) -> (i32, i32, i32) {
    %c0_i32 = arith.constant 0 : i32
    %c0_i32_0 = arith.constant 0 : i32
    %c0_i32_1 = arith.constant 0 : i32
    return %arg0, %c0_i32, %c0_i32_0 : i32, i32, i32
  }
  func.func @transform_4(%arg0: i32, %arg1: i32) -> (i32, i32, i32) {
    %c0_i32 = arith.constant 0 : i32
    %c0_i32_0 = arith.constant 0 : i32
    return %arg0, %c0_i32, %arg1 : i32, i32, i32
  }
}

module attributes {stable_mosaic.version = 11 : i64} {
  func.func @_dense_fullk_kernel(%arg0: i32, %arg1: i32, %arg2: memref<8x32xbf16, #tpu.memory_space<vmem>>, %arg3: memref<32x64xbf16, #tpu.memory_space<vmem>>, %arg4: memref<1x64xf32, #tpu.memory_space<vmem>>, %arg5: memref<8x64xbf16, #tpu.memory_space<vmem>>) attributes {dimension_semantics = [#tpu.dimension_semantics<parallel>, #tpu.dimension_semantics<parallel>], iteration_bounds = array<i64: 2, 1>, scalar_prefetch = 0 : i64, scratch_operands = 0 : i64, tpu.core_type = #tpu.core_type<tc>, window_params = [{transform_indices = @transform_0, window_bounds = array<i64: 8, 32>}, {transform_indices = @transform_1, window_bounds = array<i64: 32, 64>}, {transform_indices = @transform_2, window_bounds = array<i64: 1, 64>}, {transform_indices = @transform_3, window_bounds = array<i64: 8, 64>}]} {
    %c0 = arith.constant 0 : index
    %c0_0 = arith.constant 0 : index
    %0 = vector.load %arg2[%c0, %c0_0] : memref<8x32xbf16, #tpu.memory_space<vmem>>, vector<8x32xbf16>
    %c0_1 = arith.constant 0 : index
    %c0_2 = arith.constant 0 : index
    %1 = vector.load %arg3[%c0_1, %c0_2] : memref<32x64xbf16, #tpu.memory_space<vmem>>, vector<32x64xbf16>
    %cst = arith.constant dense<0.000000e+00> : vector<8x64xf32>
    %2 = tpu.matmul %0, %1, %cst {dimension_numbers = #tpu.dot_dimension_numbers<[1], [0], [0], [1], [0, 0, 1, 1], [], []>} : vector<8x32xbf16>, vector<32x64xbf16>, vector<8x64xf32> -> vector<8x64xf32>
    %c0_3 = arith.constant 0 : index
    %c0_4 = arith.constant 0 : index
    %3 = vector.load %arg4[%c0_3, %c0_4] : memref<1x64xf32, #tpu.memory_space<vmem>>, vector<1x64xf32>
    %4 = vector.broadcast %3 : vector<1x64xf32> to vector<8x64xf32>
    %5 = arith.addf %2, %4 : vector<8x64xf32>
    %6 = arith.mulf %5, %5 : vector<8x64xf32>
    %7 = arith.mulf %5, %6 : vector<8x64xf32>
    %cst_5 = arith.constant 4.471500e-02 : f32
    %8 = vector.broadcast %cst_5 : f32 to vector<8x64xf32>
    %9 = arith.mulf %8, %7 : vector<8x64xf32>
    %10 = arith.addf %5, %9 : vector<8x64xf32>
    %cst_6 = arith.constant 0.797884583 : f32
    %11 = vector.broadcast %cst_6 : f32 to vector<8x64xf32>
    %12 = arith.mulf %11, %10 : vector<8x64xf32>
    %13 = math.tanh %12 : vector<8x64xf32>
    %cst_7 = arith.constant 1.000000e+00 : f32
    %14 = vector.broadcast %cst_7 : f32 to vector<8x64xf32>
    %15 = arith.addf %14, %13 : vector<8x64xf32>
    %cst_8 = arith.constant 5.000000e-01 : f32
    %16 = vector.broadcast %cst_8 : f32 to vector<8x64xf32>
    %17 = arith.mulf %16, %15 : vector<8x64xf32>
    %18 = arith.mulf %5, %17 : vector<8x64xf32>
    %19 = arith.truncf %18 : vector<8x64xf32> to vector<8x64xbf16>
    %c0_9 = arith.constant 0 : index
    %c0_10 = arith.constant 0 : index
    %20 = vector.load %arg5[%c0_9, %c0_10] : memref<8x64xbf16, #tpu.memory_space<vmem>>, vector<8x64xbf16>
    tpu.vector_store %arg5[%c0_9, %c0_10], %19 {strides = array<i32>} : memref<8x64xbf16, #tpu.memory_space<vmem>>, vector<8x64xbf16>,
    return
  }
  func.func @transform_0(%arg0: i32, %arg1: i32) -> (i32, i32) {
    %c0_i32 = arith.constant 0 : i32
    %c0_i32_0 = arith.constant 0 : i32
    return %arg0, %c0_i32 : i32, i32
  }
  func.func @transform_1(%arg0: i32, %arg1: i32) -> (i32, i32) {
    %c0_i32 = arith.constant 0 : i32
    %c0_i32_0 = arith.constant 0 : i32
    return %c0_i32, %arg1 : i32, i32
  }
  func.func @transform_2(%arg0: i32, %arg1: i32) -> (i32, i32) {
    %c0_i32 = arith.constant 0 : i32
    %c0_i32_0 = arith.constant 0 : i32
    return %c0_i32, %arg1 : i32, i32
  }
  func.func @transform_3(%arg0: i32, %arg1: i32) -> (i32, i32) {
    %c0_i32 = arith.constant 0 : i32
    return %arg0, %arg1 : i32, i32
  }
}

module attributes {stable_mosaic.version = 11 : i64} {
  func.func @_dense_res_ln_fullk_kernel(%arg0: i32, %arg1: memref<8x64xbf16, #tpu.memory_space<vmem>>, %arg2: memref<64x32xbf16, #tpu.memory_space<vmem>>, %arg3: memref<1x32xf32, #tpu.memory_space<vmem>>, %arg4: memref<8x32xbf16, #tpu.memory_space<vmem>>, %arg5: memref<1x32xf32, #tpu.memory_space<vmem>>, %arg6: memref<1x32xf32, #tpu.memory_space<vmem>>, %arg7: memref<8x32xbf16, #tpu.memory_space<vmem>>) attributes {dimension_semantics = [#tpu.dimension_semantics<parallel>], iteration_bounds = array<i64: 2>, scalar_prefetch = 0 : i64, scratch_operands = 0 : i64, tpu.core_type = #tpu.core_type<tc>, window_params = [{transform_indices = @transform_0, window_bounds = array<i64: 8, 64>}, {pipeline_mode = #tpu.pipeline_mode<synchronous>, transform_indices = @transform_1, window_bounds = array<i64: 64, 32>}, {pipeline_mode = #tpu.pipeline_mode<synchronous>, transform_indices = @transform_2, window_bounds = array<i64: 1, 32>}, {transform_indices = @transform_3, window_bounds = array<i64: 8, 32>}, {pipeline_mode = #tpu.pipeline_mode<synchronous>, transform_indices = @transform_4, window_bounds = array<i64: 1, 32>}, {pipeline_mode = #tpu.pipeline_mode<synchronous>, transform_indices = @transform_5, window_bounds = array<i64: 1, 32>}, {transform_indices = @transform_6, window_bounds = array<i64: 8, 32>}]} {
    %c0 = arith.constant 0 : index
    %c0_0 = arith.constant 0 : index
    %0 = vector.load %arg1[%c0, %c0_0] : memref<8x64xbf16, #tpu.memory_space<vmem>>, vector<8x64xbf16>
    %c0_1 = arith.constant 0 : index
    %c0_2 = arith.constant 0 : index
    %1 = vector.load %arg2[%c0_1, %c0_2] : memref<64x32xbf16, #tpu.memory_space<vmem>>, vector<64x32xbf16>
    %cst = arith.constant dense<0.000000e+00> : vector<8x32xf32>
    %2 = tpu.matmul %0, %1, %cst {dimension_numbers = #tpu.dot_dimension_numbers<[1], [0], [0], [1], [0, 0, 1, 1], [], []>} : vector<8x64xbf16>, vector<64x32xbf16>, vector<8x32xf32> -> vector<8x32xf32>
    %c0_3 = arith.constant 0 : index
    %c0_4 = arith.constant 0 : index
    %3 = vector.load %arg3[%c0_3, %c0_4] : memref<1x32xf32, #tpu.memory_space<vmem>>, vector<1x32xf32>
    %4 = vector.broadcast %3 : vector<1x32xf32> to vector<8x32xf32>
    %5 = arith.addf %2, %4 : vector<8x32xf32>
    %c0_5 = arith.constant 0 : index
    %c0_6 = arith.constant 0 : index
    %6 = vector.load %arg4[%c0_5, %c0_6] : memref<8x32xbf16, #tpu.memory_space<vmem>>, vector<8x32xbf16>
    %7 = arith.extf %6 : vector<8x32xbf16> to vector<8x32xf32>
    %8 = arith.addf %5, %7 : vector<8x32xf32>
    %cst_7 = arith.constant dense<0.000000e+00> : vector<8xf32>
    %9 = vector.multi_reduction <add>, %8, %cst_7 [1] : vector<8x32xf32> to vector<8xf32>
    %10 = vector.shape_cast %9 : vector<8xf32> to vector<8x1xf32>
    %cst_8 = arith.constant 3.200000e+01 : f32
    %11 = vector.broadcast %cst_8 : f32 to vector<8x1xf32>
    %12 = arith.divf %10, %11 : vector<8x1xf32>
    %13 = vector.broadcast %12 : vector<8x1xf32> to vector<8x32xf32>
    %14 = arith.subf %8, %13 : vector<8x32xf32>
    %15 = arith.mulf %14, %14 : vector<8x32xf32>
    %cst_9 = arith.constant dense<0.000000e+00> : vector<8xf32>
    %16 = vector.multi_reduction <add>, %15, %cst_9 [1] : vector<8x32xf32> to vector<8xf32>
    %17 = vector.shape_cast %16 : vector<8xf32> to vector<8x1xf32>
    %cst_10 = arith.constant 3.200000e+01 : f32
    %18 = vector.broadcast %cst_10 : f32 to vector<8x1xf32>
    %19 = arith.divf %17, %18 : vector<8x1xf32>
    %20 = vector.broadcast %12 : vector<8x1xf32> to vector<8x32xf32>
    %21 = arith.subf %8, %20 : vector<8x32xf32>
    %cst_11 = arith.constant 9.99999996E-13 : f32
    %22 = vector.broadcast %cst_11 : f32 to vector<8x1xf32>
    %23 = arith.addf %19, %22 : vector<8x1xf32>
    %24 = math.rsqrt %23 : vector<8x1xf32>
    %25 = vector.broadcast %24 : vector<8x1xf32> to vector<8x32xf32>
    %26 = arith.mulf %21, %25 : vector<8x32xf32>
    %c0_12 = arith.constant 0 : index
    %c0_13 = arith.constant 0 : index
    %27 = vector.load %arg5[%c0_12, %c0_13] : memref<1x32xf32, #tpu.memory_space<vmem>>, vector<1x32xf32>
    %28 = vector.broadcast %27 : vector<1x32xf32> to vector<8x32xf32>
    %29 = arith.mulf %26, %28 : vector<8x32xf32>
    %c0_14 = arith.constant 0 : index
    %c0_15 = arith.constant 0 : index
    %30 = vector.load %arg6[%c0_14, %c0_15] : memref<1x32xf32, #tpu.memory_space<vmem>>, vector<1x32xf32>
    %31 = vector.broadcast %30 : vector<1x32xf32> to vector<8x32xf32>
    %32 = arith.addf %29, %31 : vector<8x32xf32>
    %33 = arith.truncf %32 : vector<8x32xf32> to vector<8x32xbf16>
    %c0_16 = arith.constant 0 : index
    %c0_17 = arith.constant 0 : index
    %34 = vector.load %arg7[%c0_16, %c0_17] : memref<8x32xbf16, #tpu.memory_space<vmem>>, vector<8x32xbf16>
    tpu.vector_store %arg7[%c0_16, %c0_17], %33 {strides = array<i32>} : memref<8x32xbf16, #tpu.memory_space<vmem>>, vector<8x32xbf16>,
    return
  }
  func.func @transform_0(%arg0: i32) -> (i32, i32) {
    %c0_i32 = arith.constant 0 : i32
    %c0_i32_0 = arith.constant 0 : i32
    return %arg0, %c0_i32 : i32, i32
  }
  func.func @transform_1(%arg0: i32) -> (i32, i32) {
    %c0_i32 = arith.constant 0 : i32
    %c0_i32_0 = arith.constant 0 : i32
    %c0_i32_1 = arith.constant 0 : i32
    return %c0_i32, %c0_i32_0 : i32, i32
  }
  func.func @transform_2(%arg0: i32) -> (i32, i32) {
    %c0_i32 = arith.constant 0 : i32
    %c0_i32_0 = arith.constant 0 : i32
    %c0_i32_1 = arith.constant 0 : i32
    return %c0_i32, %c0_i32_0 : i32, i32
  }
  func.func @transform_3(%arg0: i32) -> (i32, i32) {
    %c0_i32 = arith.constant 0 : i32
    %c0_i32_0 = arith.constant 0 : i32
    return %arg0, %c0_i32 : i32, i32
  }
  func.func @transform_4(%arg0: i32) -> (i32, i32) {
    %c0_i32 = arith.constant 0 : i32
    %c0_i32_0 = arith.constant 0 : i32
    %c0_i32_1 = arith.constant 0 : i32
    return %c0_i32, %c0_i32_0 : i32, i32
  }
  func.func @transform_5(%arg0: i32) -> (i32, i32) {
    %c0_i32 = arith.constant 0 : i32
    %c0_i32_0 = arith.constant 0 : i32
    %c0_i32_1 = arith.constant 0 : i32
    return %c0_i32, %c0_i32_0 : i32, i32
  }
  func.func @transform_6(%arg0: i32) -> (i32, i32) {
    %c0_i32 = arith.constant 0 : i32
    %c0_i32_0 = arith.constant 0 : i32
    return %arg0, %c0_i32 : i32, i32
  }
}

module attributes {stable_mosaic.version = 11 : i64} {
  func.func @_pool_head_kernel(%arg0: i32, %arg1: memref<1x8x32xbf16, #tpu.memory_space<vmem>>, %arg2: memref<1x64xf32, #tpu.memory_space<vmem>>, %arg3: memref<1x1xf32, #tpu.memory_space<vmem>>, %arg4: memref<2x1xf32, #tpu.memory_space<vmem>>) attributes {dimension_semantics = [#tpu.dimension_semantics<arbitrary>], iteration_bounds = array<i64: 2>, scalar_prefetch = 0 : i64, scratch_operands = 0 : i64, tpu.core_type = #tpu.core_type<tc>, window_params = [{transform_indices = @transform_0, window_bounds = array<i64: 1, 8, 32>}, {pipeline_mode = #tpu.pipeline_mode<synchronous>, transform_indices = @transform_1, window_bounds = array<i64: 1, 64>}, {pipeline_mode = #tpu.pipeline_mode<synchronous>, transform_indices = @transform_2, window_bounds = array<i64: 1, 1>}, {pipeline_mode = #tpu.pipeline_mode<synchronous>, transform_indices = @transform_3, window_bounds = array<i64: 2, 1>}]} {
    %c0 = arith.constant 0 : index
    %c0_0 = arith.constant 0 : index
    %c0_1 = arith.constant 0 : index
    %0 = vector.load %arg1[%c0, %c0_0, %c0_1] : memref<1x8x32xbf16, #tpu.memory_space<vmem>>, vector<1x8x32xbf16>
    %1 = vector.shape_cast %0 : vector<1x8x32xbf16> to vector<8x32xbf16>
    %2 = arith.extf %1 : vector<8x32xbf16> to vector<8x32xf32>
    %cst = arith.constant dense<0.000000e+00> : vector<32xf32>
    %3 = vector.multi_reduction <add>, %2, %cst [0] : vector<8x32xf32> to vector<32xf32>
    %4 = vector.shape_cast %3 : vector<32xf32> to vector<1x32xf32>
    %cst_2 = arith.constant 8.000000e+00 : f32
    %5 = vector.broadcast %cst_2 : f32 to vector<1x32xf32>
    %6 = arith.divf %4, %5 : vector<1x32xf32>
    %cst_3 = arith.constant dense<0xFF800000> : vector<32xf32>
    %7 = vector.multi_reduction <maximumf>, %2, %cst_3 [0] : vector<8x32xf32> to vector<32xf32>
    %8 = vector.shape_cast %7 : vector<32xf32> to vector<1x32xf32>
    %c0_4 = arith.constant 0 : index
    %c0_5 = arith.constant 0 : index
    %9 = vector.load %arg2[%c0_4, %c0_5] : memref<1x64xf32, #tpu.memory_space<vmem>>, vector<1x64xf32>
    %10 = vector.extract_strided_slice %9 {offsets = [0, 0], sizes = [1, 32], strides = [1, 1]} : vector<1x64xf32> to vector<1x32xf32>
    %11 = arith.mulf %6, %10 : vector<1x32xf32>
    %cst_6 = arith.constant dense<0.000000e+00> : vector<1xf32>
    %12 = vector.multi_reduction <add>, %11, %cst_6 [1] : vector<1x32xf32> to vector<1xf32>
    %13 = vector.shape_cast %12 : vector<1xf32> to vector<1x1xf32>
    %14 = vector.extract_strided_slice %9 {offsets = [0, 32], sizes = [1, 32], strides = [1, 1]} : vector<1x64xf32> to vector<1x32xf32>
    %15 = arith.mulf %8, %14 : vector<1x32xf32>
    %cst_7 = arith.constant dense<0.000000e+00> : vector<1xf32>
    %16 = vector.multi_reduction <add>, %15, %cst_7 [1] : vector<1x32xf32> to vector<1xf32>
    %17 = vector.shape_cast %16 : vector<1xf32> to vector<1x1xf32>
    %18 = arith.addf %13, %17 : vector<1x1xf32>
    %c0_8 = arith.constant 0 : index
    %c0_9 = arith.constant 0 : index
    %19 = vector.load %arg3[%c0_8, %c0_9] : memref<1x1xf32, #tpu.memory_space<vmem>>, vector<1x1xf32>
    %20 = arith.addf %18, %19 : vector<1x1xf32>
    %21 = arith.index_cast %arg0 : i32 to index
    %c0_10 = arith.constant 0 : index
    %22 = vector.load %arg4[%21, %c0_10] : memref<2x1xf32, #tpu.memory_space<vmem>>, vector<1x1xf32>
    tpu.vector_store %arg4[%21, %c0_10], %20 {strides = array<i32>} : memref<2x1xf32, #tpu.memory_space<vmem>>, vector<1x1xf32>,
    return
  }
  func.func @transform_0(%arg0: i32) -> (i32, i32, i32) {
    %c0_i32 = arith.constant 0 : i32
    %c0_i32_0 = arith.constant 0 : i32
    %c0_i32_1 = arith.constant 0 : i32
    return %arg0, %c0_i32, %c0_i32_0 : i32, i32, i32
  }
  func.func @transform_1(%arg0: i32) -> (i32, i32) {
    %c0_i32 = arith.constant 0 : i32
    %c0_i32_0 = arith.constant 0 : i32
    %c0_i32_1 = arith.constant 0 : i32
    return %c0_i32, %c0_i32_0 : i32, i32
  }
  func.func @transform_2(%arg0: i32) -> (i32, i32) {
    %c0_i32 = arith.constant 0 : i32
    %c0_i32_0 = arith.constant 0 : i32
    %c0_i32_1 = arith.constant 0 : i32
    return %c0_i32, %c0_i32_0 : i32, i32
  }
  func.func @transform_3(%arg0: i32) -> (i32, i32) {
    %c0_i32 = arith.constant 0 : i32
    %c0_i32_0 = arith.constant 0 : i32
    %c0_i32_1 = arith.constant 0 : i32
    return %c0_i32, %c0_i32_0 : i32, i32
  }
}

</mosaic_0001>

<bundles_post_ra>
// kernel: forward.12
= control target key start
LH: loop header
LB: loop body
LE: loop exit
PB: predicated region body
PF: predicated region fallthrough
CT: control target
= control target key end

     0   :  { %s303_s12 = smov 0   ;;  %s326_s0 = inlined_call_operand.vmem [shape: f32[16,32], index: 0, kind: input, shape index: {}]   ;;  %s327_s1 = inlined_call_operand.vmem [shape: f32[1,32], index: 1, kind: input, shape index: {}]   ;;  %s328_s2 = inlined_call_operand.vmem [shape: f32[1,32], index: 2, kind: input, shape index: {}]   ;;  %s329_s3 = inlined_call_operand.vmem [shape: bf16[16,32], index: 3, kind: output, shape index: {}]  }
   0x1 LB: > { %s254_s13 = sadd.s32 4294967295, %s281_s12   ;;  %p258_p0 = scmp.ge.s32.totalorder %s281_s12, 1  ;;  %s281_s12 = sphi %s303_s12, %s13_s12  }
   0x2   : > { %p136_p1 = scmp.lt.s32.totalorder %s281_s12, 3 }
   0x4   : > { %p137_p2 = pnand %p258_p0, %p136_p1 }
   0x5   : > { %p158_p3 = scmp.lt.s32.totalorder (!%p137_p2), %s254_s13, 1  ;;  %vm167_vm0 = vcmask (!%p137_p2), 261120   ;;  %v261_v11 = vld [vmem:[%s327_s1] ss:$0 sm:$0xff] (!%p137_p2)  ;;  %vm199_vm1 = vcmask (!%p137_p2), 257024  }
   0x6   : > { %140 = sbr.rel (%p137_p2) target bundleno = 333 (0x14d), region = 32  ;;  %v262_v13 = vld [vmem:[%s328_s2] ss:$0 sm:$0xff] (!%p137_p2) }
   0xd   : > { %s331_s13 = smov (!%p158_p3, %s254_s13), 1 }
   0xe   : > { %s259_s14 = sshll.u32 %s331_s13, 3  ;;  %s260_s22 = sshll.u32 %s331_s13, 2 }
   0xf   : > { %s161_s17 = scalar_lea.vmem %s326_s0, %s259_s14  ;;  %s165_s25 = scalar_lea.vmem %s329_s3, %s260_s22 }
  0x10   : > { %v166_v0 = vld [vmem:[%s161_s17] sm:$0xff] }
  0x11   : > { %v168_v1 = vsel %vm167_vm0, %v166_v0, 0.0 }
  0x12   : > { %169 = vadd.xlane.f32.xlu0 %v168_v1 }
  0x9f   : > { %v170_v2 = vpop.xlane.xlu0 %169 }
  0xa0   : > { %v172_v3 = vmul.f32 0.03125, %v170_v2 }
  0xa2   : > { %v173_v4 = vsub.f32 %v166_v0, %v172_v3 }
  0xa4   : > { %v174_v5 = vmul.f32 %v173_v4, %v173_v4 }
  0xa6   : > { %v175_v6 = vsel %vm167_vm0, %v174_v5, 0.0 }
  0xa7   : > { %176 = vadd.xlane.f32.xlu0 %v175_v6 }
 0x134   : > { %v177_v7 = vpop.xlane.xlu0 %176 }
 0x135   : > { %v178_v8 = vmul.f32 0.03125, %v177_v7 }
 0x137   : > { %v179_v9 = vadd.f32 1e-12, %v178_v8 }
 0x139   : > { %273 = vrsqrt.f32 %v179_v9 }
 0x143   : > { %v274_v10 = vpop.eup %273 }
 0x144   : > { %v181_v12 = vmul.f32 %v274_v10, %v173_v4 }
 0x146   : > { %v189_v14 = vmul.f32 %v261_v11, %v181_v12 }
 0x148   : > { %v197_v15 = vadd.f32 %v262_v13, %v189_v14 }
 0x14a   : > { %v198_v16 = vpack.c.bf16 %v197_v15, %v197_v15 }
 0x14c   : > { %200 = vst.msk [vmem:[%s165_s25] sm:$0xf] %vm199_vm1, %v198_v16 }
 0x14d PF: > { %s13_s12 = sadd.s32 1, %s281_s12  }
 0x14e   : > { %p10_p4 = scmp.ge.s32.totalorder %s13_s12, 4  }
 0x150   :  { %12 = sbr.rel (!%p10_p4) target bundleno = 1 (0x1), region = 62 }

// kernel: forward.13
= control target key start
LH: loop header
LB: loop body
LE: loop exit
PB: predicated region body
PF: predicated region fallthrough
CT: control target
= control target key end

     0   :  { %s488_s12 = smov 0   ;;  %s490_s13 = smov 0   ;;  %s530_s0 = inlined_call_operand.vmem [shape: bf16[16,32], index: 0, kind: input, shape index: {}]   ;;  %s531_s1 = inlined_call_operand.vmem [shape: bf16[32,96], index: 1, kind: input, shape index: {}]   ;;  %s532_s2 = inlined_call_operand.vmem [shape: f32[1,96], index: 2, kind: input, shape index: {}]   ;;  %s533_s3 = inlined_call_operand.vmem [shape: bf16[16,96], index: 3, kind: output, shape index: {}]  }
   0x1   :  { %s492_s14 = smov 0  }
   0x2 LB: > { %s25_s15 = sadd.s32 1, %s460_s13  ;;  %p394_p0 = scmp.ge.s32.totalorder %s464_s14, 1  ;;  %s464_s14 = sphi %s492_s14, %s13_s14   ;;  %s460_s13 = sphi %s490_s13, %s535_s13   ;;  %s456_s12 = sphi %s488_s12, %s534_s12  }
   0x3   : > { %p27_p1 = scmp.ge.s32.totalorder %s25_s15, 2  ;;  %p167_p2 = scmp.lt.s32.totalorder %s464_s14, 3 }
   0x5   : > { %s537_s15 = smov (%p27_p1, %s25_s15), 0  ;;  %p168_p3 = pnand %p394_p0, %p167_p2 }
   0x6   : > { %v440_v0 = vld [vmem:[%s531_s1] sm:$0xff] (!%p168_p3)   ;;  %v466_v1 = vmov (!%p168_p3), 0.0   ;;  %v441_v2 = vld [vmem:[%s531_s1 + $0x8] sm:$0xff] (!%p168_p3)   ;;  %vm467_vm0 = vmmov (!%p168_p3), 0   ;;  %p199_p4 = scmp.lt.s32.totalorder (!%p168_p3), %s456_s12, 1  ;;  %vm242_vm1 = vcmask (!%p168_p3), 261120  }
   0x7   : > { %171 = sbr.rel (%p168_p3) target bundleno = 235 (0xeb), region = 32  ;;  %406 = vmatprep.subr.bf16.mxu0 (!%p168_p3), %v466_v1  ;;  %410 = vmatprep.mubr.msk.bf16.mxu0 (!%p168_p3), %vm467_vm0, %v466_v1  ;;  %v397_v4 = vld [vmem:[%s532_s2] ss:$0 sm:$0xff] (!%p168_p3)  ;;  %vm287_vm2 = vcmask (!%p168_p3), 781312  }
   0x8   : > { %407 = vmatpush3.bf16.msra.mxu0 (!%p168_p3), %v440_v0 }
   0x9   : > { %408 = vmatprep.subr.bf16.mxu0 (!%p168_p3), %v466_v1 }
   0xc   : > { %409 = vmatpush3.bf16.msra.mxu0 (!%p168_p3), %v441_v2 }
   0xe   : > { %s539_s12 = smov (!%p199_p4, %s456_s12), 1 }
   0xf   : > { %s395_s20 = sshll.u32 %s539_s12, 2 }
  0x10   : > { %s202_s23 = scalar_lea.vmem %s530_s0, %s395_s20  ;;  %s216_s28 = scalar_lea.vmem %s533_s3, %s395_s20 }
  0x11   : > { %v218_v3 = vld [vmem:[%s202_s23] sm:$0xf] }
  0x12   : > { %411 = vmatmul.mubr.msk.bf16.vlgmr.msra.gmra.mrb[0].mxu0 %vm242_vm1, %v218_v3 }
  0xe5   : > { %v280_v5 = vpop.f32.mrb[0].mxu0 }
  0xe6   : > { %v281_v6 = vadd.f32 %v397_v4, %v280_v5  ;;  %v412_v7 = vpop.f32.mrb[1].mxu0 }
  0xe7   : > { %v283_v8 = vpop.f32.mrb[2].mxu0 }
  0xe8   : > { %v286_v9 = vpack.c.bf16 %v281_v6, %v281_v6  ;;  %v413_v10 = vpop.f32.mrb[3].mxu0 }
  0xea   : > { %288 = vst.msk [vmem:[%s216_s28] sm:$0xf] %vm287_vm2, %v286_v9 }
  0xeb PF: > { %s13_s14 = sadd.s32 1, %s464_s14   ;;  %s534_s12 = smov %s460_s13 }
  0xec   : > { %p10_p5 = scmp.ge.s32.totalorder %s13_s14, 4   ;;  %s535_s13 = smov %s537_s15 }
  0xee   :  { %12 = sbr.rel (!%p10_p5) target bundleno = 2 (0x2), region = 68 }

// kernel: forward.15
= control target key start
LH: loop header
LB: loop body
LE: loop exit
PB: predicated region body
PF: predicated region fallthrough
CT: control target
= control target key end

     0   :  { %s520_s21 = smov 0   ;;  %s563_s0 = inlined_call_operand.vmem [shape: bf16[16,32], index: 0, kind: input, shape index: {}]   ;;  %s564_s1 = inlined_call_operand.vmem [shape: bf16[32,32], index: 1, kind: input, shape index: {}]   ;;  %s565_s2 = inlined_call_operand.vmem [shape: f32[1,32], index: 2, kind: input, shape index: {}]   ;;  %s566_s3 = inlined_call_operand.vmem [shape: bf16[16,32], index: 3, kind: input, shape index: {}]   ;;  %s567_s4 = inlined_call_operand.vmem [shape: f32[1,32], index: 4, kind: input, shape index: {}]   ;;  %s568_s5 = inlined_call_operand.vmem [shape: f32[1,32], index: 5, kind: input, shape index: {}]   ;;  %s569_s6 = inlined_call_operand.vmem [shape: bf16[16,32], index: 6, kind: output, shape index: {}]  }
   0x1 LB: > { %s434_s22 = sadd.s32 4294967295, %s481_s21   ;;  %p438_p0 = scmp.ge.s32.totalorder %s481_s21, 1  ;;  %s481_s21 = sphi %s520_s21, %s16_s21  }
   0x2   : > { %p220_p1 = scmp.lt.s32.totalorder %s481_s21, 3 }
   0x4   : > { %p221_p2 = pnand %p438_p0, %p220_p1 }
   0x5   : > { %v471_v0 = vld [vmem:[%s564_s1] sm:$0xff] (!%p221_p2)   ;;  %v483_v1 = vmov (!%p221_p2), 0.0   ;;  %v472_v2 = vld [vmem:[%s564_s1 + $0x8] sm:$0xff] (!%p221_p2)   ;;  %vm484_vm0 = vmmov (!%p221_p2), 0   ;;  %p252_p3 = scmp.lt.s32.totalorder (!%p221_p2), %s434_s22, 1  ;;  %vm289_vm1 = vcmask (!%p221_p2), 261120  }
   0x6   : > { %224 = sbr.rel (%p221_p2) target bundleno = 549 (0x225), region = 44  ;;  %453 = vmatprep.subr.bf16.mxu0 (!%p221_p2), %v483_v1  ;;  %457 = vmatprep.mubr.msk.bf16.mxu0 (!%p221_p2), %vm484_vm0, %v483_v1  ;;  %v442_v5 = vld [vmem:[%s565_s2] ss:$0 sm:$0xff] (!%p221_p2)  ;;  %vm367_vm2 = vcmask (!%p221_p2), 257024  }
   0x7   : > { %454 = vmatpush3.bf16.msra.mxu0 (!%p221_p2), %v471_v0  ;;  %v446_v23 = vld [vmem:[%s567_s4] ss:$0 sm:$0xff] (!%p221_p2) }
   0x8   : > { %455 = vmatprep.subr.bf16.mxu0 (!%p221_p2), %v483_v1  ;;  %v447_v25 = vld [vmem:[%s568_s5] ss:$0 sm:$0xff] (!%p221_p2) }
   0xb   : > { %456 = vmatpush3.bf16.msra.mxu0 (!%p221_p2), %v472_v2 }
   0xd   : > { %s571_s22 = smov (!%p252_p3, %s434_s22), 1 }
   0xe   : > { %s534_s27 = sshll.u32 %s571_s22, 2 }
   0xf   : > { %s255_s30 = scalar_lea.vmem %s563_s0, %s534_s27  ;;  %s259_s9 = scalar_lea.vmem %s566_s3, %s534_s27 }
  0x10   : > { %v265_v3 = vld [vmem:[%s255_s30] sm:$0xf]  ;;  %s263_s18 = scalar_lea.vmem %s569_s6, %s534_s27 }
  0x11   : > { %458 = vmatmul.mubr.msk.bf16.vlgmr.msra.gmra.mrb[0].mxu0 %vm289_vm1, %v265_v3  ;;  %v333_v4 = vld [vmem:[%s259_s9] sm:$0xf] }
  0x12   : > { %v334_v6 = vunpack.c.l.bf16 %v333_v4 }
  0xe4   : > { %v327_v7 = vpop.f32.mrb[0].mxu0 }
  0xe5   : > { %v328_v8 = vadd.f32 %v442_v5, %v327_v7  ;;  %v459_v9 = vpop.f32.mrb[1].mxu0 }
  0xe6   : > { %v330_v10 = vpop.f32.mrb[2].mxu0 }
  0xe7   : > { %v460_v11 = vpop.f32.mrb[3].mxu0  ;;  %v335_v12 = vadd.f32 %v334_v6, %v328_v8 }
  0xe9   : > { %v336_v13 = vsel %vm289_vm1, %v335_v12, 0.0 }
  0xea   : > { %337 = vadd.xlane.f32.xlu0 %v336_v13 }
 0x177   : > { %v338_v14 = vpop.xlane.xlu0 %337 }
 0x178   : > { %v340_v15 = vmul.f32 0.03125, %v338_v14 }
 0x17a   : > { %v341_v16 = vsub.f32 %v335_v12, %v340_v15 }
 0x17c   : > { %v342_v17 = vmul.f32 %v341_v16, %v341_v16 }
 0x17e   : > { %v343_v18 = vsel %vm289_vm1, %v342_v17, 0.0 }
 0x17f   : > { %344 = vadd.xlane.f32.xlu0 %v343_v18 }
 0x20c   : > { %v345_v19 = vpop.xlane.xlu0 %344 }
 0x20d   : > { %v346_v20 = vmul.f32 0.03125, %v345_v19 }
 0x20f   : > { %v347_v21 = vadd.f32 1e-12, %v346_v20 }
 0x211   : > { %473 = vrsqrt.f32 %v347_v21 }
 0x21b   : > { %v474_v22 = vpop.eup %473 }
 0x21c   : > { %v349_v24 = vmul.f32 %v474_v22, %v341_v16 }
 0x21e   : > { %v357_v26 = vmul.f32 %v446_v23, %v349_v24 }
 0x220   : > { %v365_v27 = vadd.f32 %v447_v25, %v357_v26 }
 0x222   : > { %v366_v28 = vpack.c.bf16 %v365_v27, %v365_v27 }
 0x224   : > { %368 = vst.msk [vmem:[%s263_s18] sm:$0xf] %vm367_vm2, %v366_v28 }
 0x225 PF: > { %s16_s21 = sadd.s32 1, %s481_s21  }
 0x226   : > { %p13_p4 = scmp.ge.s32.totalorder %s16_s21, 4  }
 0x228   :  { %15 = sbr.rel (!%p13_p4) target bundleno = 1 (0x1), region = 77 }

// kernel: forward.14
= control target key start
LH: loop header
LB: loop body
LE: loop exit
PB: predicated region body
PF: predicated region fallthrough
CT: control target
= control target key end

     0   :  { %s1055_s15 = smov 0   ;;  %s1057_s16 = smov 0   ;;  %s1167_s0 = inlined_call_operand.vmem [shape: bf16[2,8,96], index: 0, kind: input, shape index: {}, may-alias: {0,1,2}]   ;;  %s1168_s1 = inlined_call_operand.vmem [shape: bf16[2,8,96], index: 1, kind: input, shape index: {}, may-alias: {0,1,2}]   ;;  %s1169_s2 = inlined_call_operand.vmem [shape: bf16[2,8,96], index: 2, kind: input, shape index: {}, may-alias: {0,1,2}]   ;;  %s1170_s3 = inlined_call_operand.vmem [shape: f32[2,1,8], index: 3, kind: input, shape index: {}]   ;;  %s1171_s4 = inlined_call_operand.vmem [shape: bf16[2,8,32], index: 4, kind: output, shape index: {}]  }
   0x1   :  { %s1059_s17 = smov 0  }
   0x2 LB: > { %s26_s18 = sadd.s32 1, %s1008_s16  ;;  %p850_p0 = scmp.ge.s32.totalorder %s1012_s17, 1  ;;  %s1012_s17 = sphi %s1059_s17, %s14_s17   ;;  %s1008_s16 = sphi %s1057_s16, %s1173_s16   ;;  %s1004_s15 = sphi %s1055_s15, %s1172_s15  }
   0x3   : > { %p28_p1 = scmp.ge.s32.totalorder %s26_s18, 2  ;;  %p201_p2 = scmp.lt.s32.totalorder %s1012_s17, 3 }
   0x5   : > { %s1175_s18 = smov (%p28_p1, %s26_s18), 0  ;;  %p202_p3 = pnand %p850_p0, %p201_p2 }
   0x6   : > { %p239_p4 = scmp.lt.s32.totalorder (!%p202_p3), %s1004_s15, 1  ;;  %v1014_v0 = vmov (!%p202_p3), 0.0   ;;  %vm1015_vm0 = vmmov (!%p202_p3), 0   ;;  %s1016_s23 = smov (!%p202_p3), 96   ;;  %vm280_vm1 = vcmask (!%p202_p3), 64512   ;;  %vm347_vm2 = vcmask (!%p202_p3), 1043456  }
   0x7   : > { %205 = sbr.rel (%p202_p3) target bundleno = 1601 (0x641), region = 36  ;;  %884 = vmatprep.subr.bf16.mxu0 (!%p202_p3), %v1014_v0  ;;  %886 = vmatprep.mubr.msk.bf16.mxu0 (!%p202_p3), %vm1015_vm0, %v1014_v0  ;;  %s1017_s30 = smov (!%p202_p3), 64   ;;  %vm735_vm3 = vcmask (!%p202_p3), 130048   ;;  %vm737_vm4 = vcmask (!%p202_p3), 195584   ;;  %vm740_vm5 = vcmask (!%p202_p3), 257024  }
   0x8   : > { %890 = vmatprep.subr.bf16.mxu1 (!%p202_p3), %v1014_v0  ;;  %892 = vmatprep.mubr.msk.bf16.mxu1 (!%p202_p3), %vm1015_vm0, %v1014_v0  ;;  %s1018_s5 = smov (!%p202_p3), 88   ;;  %s1019_s9 = smov (!%p202_p3), 72  }
   0x9   : > { %s1020_s10 = smov (!%p202_p3), 120   ;;  %s1021_s11 = smov (!%p202_p3), 80  }
   0xa   : > { %s1022_s12 = smov (!%p202_p3), 112   ;;  %s1023_s13 = smov (!%p202_p3), 104  }
   0xb   : > { %s1024_s14 = smov (!%p202_p3), 56   ;;  %s1026_s20 = smov (!%p202_p3), 40  }
   0xc   : > { %s1027_s21 = smov (!%p202_p3), 8  }
   0xe   : > { %s1177_s15 = smov (!%p239_p4, %s1004_s15), 1 }
   0xf   : > { %s1079_s19 = sshll.u32 %s1177_s15, 2  ;;  %s253_s8 = scalar_lea.vmem %s1170_s3, %s1177_s15 }
  0x10   : > { %s246_s22 = scalar_lea.vmem %s1168_s1, %s1079_s19  ;;  %s242_s26 = scalar_lea.vmem %s1167_s0, %s1079_s19  ;;  %v1104_v9 = vld [vmem:[%s253_s8] ss:$0 sm:$0xff] }
  0x11   : > { %v972_v1 = vld [vmem:[%s246_s22] ss:$0 sps:$4 sm:$0xff]   ;;  %s250_s29 = scalar_lea.vmem %s1169_s2, %s1079_s19  ;;  %s1025_s15 = smov 48  }
  0x12   : > { %278 = vrot.lane.b32.xlu0 %v972_v1, %s1016_s23  ;;  %v263_v2 = vld [vmem:[%s242_s26] sm:$0xf]  ;;  %s1028_s22 = smov 16   ;;  %s1029_s23 = smov 24  }
  0x13   : > { %v264_v3 = vunpack.c.l.bf16 %v263_v2  ;;  %v1098_v8 = vld [vmem:[%s250_s29] ss:$0 sps:$4 sm:$0xff]   ;;  %s260_s26 = scalar_lea.vmem %s1171_s4, %s1079_s19 }
  0x14   : > { %342 = vrot.lane.b32.xlu1 %v1098_v8, %s1017_s30 }
  0x15   : > { %v265_v6 = vmul.f32 0.35355338, %v264_v3 }
  0x17   : > { %v266_v7 = vpack.c.bf16 %v265_v6, %v265_v6 }
  0x18   : > { %394 = vrot.lane.b32.xlu1 %v972_v1, %s1018_s5 }
  0x84   : > { %v279_v4 = vpop.permute.xlu0 %278 }
  0x85   : > { %v285_v5 = vsel %vm280_vm1, %v279_v4, 0 }
  0x86   : > { %885 = vmatpush3.bf16.xpose.msra.mxu0 %v285_v5  ;;  %v343_v16 = vpop.permute.xlu1 %342 }
  0x87   : > { %902 = vmatprep.subr.bf16.mxu0 %v1014_v0  ;;  %v349_v17 = vsel %vm347_vm2, %v343_v16, 0 }
  0x88   : > { %891 = vmatpush3.bf16.msra.mxu1 %v349_v17 }
  0x89   : > { %896 = vmatprep.subr.bf16.mxu1 %v1014_v0 }
  0x8a   : > { %v395_v23 = vpop.permute.xlu1 %394 }
  0x8b   : > { %v400_v29 = vsel %vm280_vm1, %v395_v23, 0 }
  0x8d   : > { %887 = vmatmul.mubr.msk.bf16.vlgmr.msra.gmra.mrb[0].mxu0 %vm280_vm1, %v266_v7 }
  0x8e   : > { %904 = vmatprep.mubr.msk.bf16.mxu0 %vm1015_vm0, %v1014_v0 }
 0x160   : > { %v321_v10 = vpop.f32.mrb[0].mxu0 }
 0x161   : > { %v322_v11 = vadd.f32 %v1104_v9, %v321_v10  ;;  %v888_v12 = vpop.f32.mrb[1].mxu0 }
 0x162   : > { %v324_v13 = vpop.f32.mrb[2].mxu0 }
 0x163   : > { %v889_v14 = vpop.f32.mrb[3].mxu0  ;;  %v327_v15 = vsel %vm280_vm1, %v322_v11, -inf }
 0x164   : > { %328 = vmax.xlane.f32.xlu0 %v327_v15 }
 0x17a   : > { %614 = vrot.lane.b32.xlu0 %v972_v1, %s1019_s9 }
 0x1f1   : > { %v329_v18 = vpop.xlane.xlu0 %328 }
 0x1f2   : > { %v330_v19 = vsub.f32 %v322_v11, %v329_v18 }
 0x1f4   : > { %v331_v20 = vmul.f32 1.442695, %v330_v19 }
 0x1f5   : > { %v615_v32 = vpop.permute.xlu0 %614 }
 0x1f6   : > { %974 = vpow2.f32 %v331_v20  ;;  %v620_v34 = vsel %vm280_vm1, %v615_v32, 0 }
 0x200   : > { %v975_v21 = vpop.eup %974 }
 0x201   : > { %v333_v22 = vsel %vm280_vm1, %v975_v21, 0.0 }
 0x202   : > { %334 = vadd.xlane.f32.xlu1 %v333_v22 }
 0x213   : > { %392 = vrot.lane.b32.xlu1 %v266_v7, %s1020_s10 }
 0x217   : > { %504 = vrot.lane.b32.xlu1 %v972_v1, %s1021_s11 }
 0x21b   : > { %502 = vrot.lane.b32.xlu1 %v266_v7, %s1022_s12 }
 0x21f   : > { %612 = vrot.lane.b32.xlu1 %v266_v7, %s1023_s13 }
 0x28f   : > { %v335_v24 = vpop.xlane.xlu1 %334 }
 0x290   : > { %976 = vrcp.f32 %v335_v24 }
 0x293   : > { %v393_v27 = vpop.permute.xlu1 %392 }
 0x297   : > { %v505_v30 = vpop.permute.xlu1 %504 }
 0x298   : > { %v510_v31 = vsel %vm280_vm1, %v505_v30, 0 }
 0x29a   : > { %v977_v25 = vpop.eup %976 }
 0x29b   : > { %v337_v26 = vmul.f32 %v977_v25, %v975_v21  ;;  %v503_v33 = vpop.permute.xlu1 %502 }
 0x29d   : > { %v338_v28 = vpack.c.bf16 %v337_v26, %v337_v26 }
 0x29f   : > { %893 = vmatmul.mubr.msk.bf16.vlgmr.msra.gmra.mrb[0].mxu1 %vm280_vm1, %v338_v28  ;;  %v613_v35 = vpop.permute.xlu1 %612 }
 0x2a0   : > { %897 = vmatpush3.bf16.xpose.msra.mxu1 %v400_v29  ;;  %898 = vmatprep.mubr.msk.bf16.mxu1 %vm1015_vm0, %v1014_v0 }
 0x2a1   : > { %908 = vmatprep.subr.bf16.mxu1 %v1014_v0 }
 0x2a7   : > { %899 = vmatmul.mubr.msk.bf16.vlgmr.msra.gmra.mrb[4].mxu1 %vm280_vm1, %v393_v27 }
 0x2a8   : > { %909 = vmatpush3.bf16.xpose.msra.mxu1 %v510_v31  ;;  %910 = vmatprep.mubr.msk.bf16.mxu1 %vm1015_vm0, %v1014_v0 }
 0x2a9   : > { %920 = vmatprep.subr.bf16.mxu1 %v1014_v0 }
 0x2af   : > { %911 = vmatmul.mubr.msk.bf16.vlgmr.msra.gmra.mrb[8].mxu1 %vm280_vm1, %v503_v33 }
 0x2b0   : > { %921 = vmatpush3.bf16.xpose.msra.mxu1 %v620_v34  ;;  %922 = vmatprep.mubr.msk.bf16.mxu1 %vm1015_vm0, %v1014_v0 }
 0x2b7   : > { %923 = vmatmul.mubr.msk.bf16.vlgmr.msra.gmra.mrb[12].mxu1 %vm280_vm1, %v613_v35 }
 0x372   : > { %v1126_v36 = vpop.f32.mrb[0].mxu1 }
 0x373   : > { %v894_v37 = vpop.f32.mrb[1].mxu1 }
 0x374   : > { %v388_v38 = vpop.f32.mrb[2].mxu1 }
 0x375   : > { %v895_v39 = vpop.f32.mrb[3].mxu1 }
 0x37a   : > { %v436_v40 = vpop.f32.mrb[4].mxu1 }
 0x37b   : > { %v437_v41 = vadd.f32 %v1104_v9, %v436_v40  ;;  %v900_v42 = vpop.f32.mrb[5].mxu1 }
 0x37c   : > { %v439_v43 = vpop.f32.mrb[6].mxu1 }
 0x37d   : > { %v901_v44 = vpop.f32.mrb[7].mxu1  ;;  %v442_v45 = vsel %vm280_vm1, %v437_v41, -inf }
 0x37e   : > { %443 = vmax.xlane.f32.xlu1 %v442_v45 }
 0x382   : > { %v546_v46 = vpop.f32.mrb[8].mxu1 }
 0x383   : > { %v547_v47 = vadd.f32 %v1104_v9, %v546_v46  ;;  %v912_v48 = vpop.f32.mrb[9].mxu1 }
 0x384   : > { %v549_v49 = vpop.f32.mrb[10].mxu1 }
 0x385   : > { %v552_v50 = vsel %vm280_vm1, %v547_v47, -inf  ;;  %v913_v51 = vpop.f32.mrb[11].mxu1 }
 0x386   : > { %553 = vmax.xlane.f32.xlu0 %v552_v50 }
 0x38a   : > { %v656_v52 = vpop.f32.mrb[12].mxu1 }
 0x38b   : > { %v657_v53 = vadd.f32 %v1104_v9, %v656_v52  ;;  %v924_v54 = vpop.f32.mrb[13].mxu1 }
 0x38c   : > { %v659_v55 = vpop.f32.mrb[14].mxu1 }
 0x38d   : > { %v662_v56 = vsel %vm280_vm1, %v657_v53, -inf  ;;  %v925_v57 = vpop.f32.mrb[15].mxu1 }
 0x38e   : > { %663 = vmax.xlane.f32.xlu1 %v662_v56 }
 0x40b   : > { %v444_v58 = vpop.xlane.xlu1 %443 }
 0x40c   : > { %v445_v59 = vsub.f32 %v437_v41, %v444_v58 }
 0x40e   : > { %v446_v60 = vmul.f32 1.442695, %v445_v59 }
 0x410   : > { %978 = vpow2.f32 %v446_v60 }
 0x413   : > { %v554_v5 = vpop.xlane.xlu0 %553 }
 0x414   : > { %v555_v6 = vsub.f32 %v547_v47, %v554_v5 }
 0x416   : > { %v556_v7 = vmul.f32 1.442695, %v555_v6 }
 0x41a   : > { %v979_v61 = vpop.eup %978 }
 0x41b   : > { %v664_v62 = vpop.xlane.xlu1 %663  ;;  %v448_v63 = vsel %vm280_vm1, %v979_v61, 0.0 }
 0x41c   : > { %v665_v1 = vsub.f32 %v657_v53, %v664_v62  ;;  %449 = vadd.xlane.f32.xlu1 %v448_v63 }
 0x41e   : > { %v666_v2 = vmul.f32 1.442695, %v665_v1 }
 0x420   : > { %980 = vpow2.f32 %v666_v2 }
 0x421   : > { %982 = vpow2.f32 %v556_v7 }
 0x42a   : > { %v981_v3 = vpop.eup %980 }
 0x42b   : > { %v668_v4 = vsel %vm280_vm1, %v981_v3, 0.0  ;;  %v983_v9 = vpop.eup %982 }
 0x42c   : > { %669 = vadd.xlane.f32.xlu0 %v668_v4  ;;  %v558_v10 = vsel %vm280_vm1, %v983_v9, 0.0 }
 0x42d   : > { %454 = vrot.lane.b32.xlu1 %v1098_v8, %s1024_s14 }
 0x442   : > { %564 = vrot.lane.b32.xlu0 %v1098_v8, %s1025_s15 }
 0x451   : > { %559 = vadd.xlane.f32.xlu1 %v558_v10 }
 0x462   : > { %674 = vrot.lane.b32.xlu1 %v1098_v8, %s1026_s20 }
 0x4a9   : > { %v450_v11 = vpop.xlane.xlu1 %449 }
 0x4aa   : > { %984 = vrcp.f32 %v450_v11 }
 0x4ad   : > { %v455_v12 = vpop.permute.xlu1 %454 }
 0x4ae   : > { %v460_v13 = vsel %vm347_vm2, %v455_v12, 0 }
 0x4af   : > { %903 = vmatpush3.bf16.msra.mxu0 %v460_v13 }
 0x4b0   : > { %914 = vmatprep.subr.bf16.mxu0 %v1014_v0 }
 0x4b4   : > { %v985_v14 = vpop.eup %984 }
 0x4b5   : > { %v452_v15 = vmul.f32 %v985_v14, %v979_v61 }
 0x4b7   : > { %v453_v16 = vpack.c.bf16 %v452_v15, %v452_v15 }
 0x4b9   : > { %905 = vmatmul.mubr.msk.bf16.vlgmr.msra.gmra.mrb[4].mxu0 %vm280_vm1, %v453_v16  ;;  %v670_v17 = vpop.xlane.xlu0 %669 }
 0x4ba   : > { %916 = vmatprep.mubr.msk.bf16.mxu0 %vm1015_vm0, %v1014_v0 }
 0x4bd   : > { %v565_v18 = vpop.permute.xlu0 %564 }
 0x4be   : > { %v570_v8 = vsel %vm347_vm2, %v565_v18, 0 }
 0x4bf   : > { %915 = vmatpush3.bf16.msra.mxu0 %v570_v8 }
 0x4c0   : > { %926 = vmatprep.subr.bf16.mxu0 %v1014_v0 }
 0x4de   : > { %v560_v19 = vpop.xlane.xlu1 %559 }
 0x4df   : > { %986 = vrcp.f32 %v560_v19 }
 0x4e0   : > { %988 = vrcp.f32 %v670_v17 }
 0x4e2   : > { %v675_v21 = vpop.permute.xlu1 %674 }
 0x4e3   : > { %v680_v23 = vsel %vm347_vm2, %v675_v21, 0 }
 0x4e9   : > { %v987_v20 = vpop.eup %986 }
 0x4ea   : > { %v562_v22 = vmul.f32 %v987_v20, %v983_v9  ;;  %v989_v25 = vpop.eup %988 }
 0x4eb   : > { %v672_v26 = vmul.f32 %v989_v25, %v981_v3 }
 0x4ec   : > { %v563_v24 = vpack.c.bf16 %v562_v22, %v562_v22 }
 0x4ed   : > { %v673_v27 = vpack.c.bf16 %v672_v26, %v672_v26 }
 0x4ee   : > { %917 = vmatmul.mubr.msk.bf16.vlgmr.msra.gmra.mrb[8].mxu0 %vm280_vm1, %v563_v24 }
 0x4ef   : > { %927 = vmatpush3.bf16.msra.mxu0 %v680_v23  ;;  %928 = vmatprep.mubr.msk.bf16.mxu0 %vm1015_vm0, %v1014_v0 }
 0x4f6   : > { %929 = vmatmul.mubr.msk.bf16.vlgmr.msra.gmra.mrb[12].mxu0 %vm280_vm1, %v673_v27 }
 0x58c   : > { %v496_v28 = vpop.f32.mrb[4].mxu0 }
 0x58d   : > { %723 = vrot.lane.b32.xlu1 %v496_v28, %s1027_s21  ;;  %v906_v29 = vpop.f32.mrb[5].mxu0 }
 0x58e   : > { %v499_v30 = vpop.f32.mrb[6].mxu0 }
 0x58f   : > { %v907_v31 = vpop.f32.mrb[7].mxu0 }
 0x5c1   : > { %v606_v32 = vpop.f32.mrb[8].mxu0 }
 0x5c2   : > { %727 = vrot.lane.b32.xlu0 %v606_v32, %s1028_s22  ;;  %v918_v33 = vpop.f32.mrb[9].mxu0 }
 0x5c3   : > { %v609_v34 = vpop.f32.mrb[10].mxu0 }
 0x5c4   : > { %v919_v35 = vpop.f32.mrb[11].mxu0 }
 0x5c9   : > { %v716_v37 = vpop.f32.mrb[12].mxu0 }
 0x5ca   : > { %731 = vrot.lane.b32.xlu1 %v716_v37, %s1029_s23  ;;  %v930_v0 = vpop.f32.mrb[13].mxu0 }
 0x5cb   : > { %v719_v38 = vpop.f32.mrb[14].mxu0 }
 0x5cc   : > { %v931_v39 = vpop.f32.mrb[15].mxu0 }
 0x5ff   : > { %v724_v40 = vpop.permute.xlu1 %723 }
 0x600   : > { %v734_v42 = vsel %vm280_vm1, %v1126_v36, %v724_v40 }
 0x634   : > { %v728_v41 = vpop.permute.xlu0 %727 }
 0x635   : > { %v736_v43 = vsel %vm735_vm3, %v734_v42, %v728_v41 }
 0x63c   : > { %v732_v44 = vpop.permute.xlu1 %731 }
 0x63d   : > { %v738_v45 = vsel %vm737_vm4, %v736_v43, %v732_v44 }
 0x63e   : > { %v739_v46 = vpack.c.bf16 %v738_v45, %v738_v45 }
 0x640   : > { %741 = vst.msk [vmem:[%s260_s26] sm:$0xf] %vm740_vm5, %v739_v46 }
 0x641 PF: > { %s14_s17 = sadd.s32 1, %s1012_s17   ;;  %s1172_s15 = smov %s1008_s16 }
 0x642   : > { %p11_p5 = scmp.ge.s32.totalorder %s14_s17, 4   ;;  %s1173_s16 = smov %s1175_s18 }
 0x644   :  { %13 = sbr.rel (!%p11_p5) target bundleno = 2 (0x2), region = 75 }

// kernel: forward.16
= control target key start
LH: loop header
LB: loop body
LE: loop exit
PB: predicated region body
PF: predicated region fallthrough
CT: control target
= control target key end

     0   :  { %s499_s12 = smov 0   ;;  %s501_s13 = smov 0   ;;  %s541_s0 = inlined_call_operand.vmem [shape: bf16[16,32], index: 0, kind: input, shape index: {}]   ;;  %s542_s1 = inlined_call_operand.vmem [shape: bf16[32,64], index: 1, kind: input, shape index: {}]   ;;  %s543_s2 = inlined_call_operand.vmem [shape: f32[1,64], index: 2, kind: input, shape index: {}]   ;;  %s544_s3 = inlined_call_operand.vmem [shape: bf16[16,64], index: 3, kind: output, shape index: {}]  }
   0x1   :  { %s503_s14 = smov 0  }
   0x2 LB: > { %s25_s15 = sadd.s32 1, %s471_s13  ;;  %p403_p0 = scmp.ge.s32.totalorder %s475_s14, 1  ;;  %s475_s14 = sphi %s503_s14, %s13_s14   ;;  %s471_s13 = sphi %s501_s13, %s546_s13   ;;  %s467_s12 = sphi %s499_s12, %s545_s12  }
   0x3   : > { %p27_p1 = scmp.ge.s32.totalorder %s25_s15, 2  ;;  %p167_p2 = scmp.lt.s32.totalorder %s475_s14, 3 }
   0x5   : > { %s548_s15 = smov (%p27_p1, %s25_s15), 0  ;;  %p168_p3 = pnand %p403_p0, %p167_p2 }
   0x6   : > { %v449_v0 = vld [vmem:[%s542_s1] sm:$0xff] (!%p168_p3)   ;;  %v477_v1 = vmov (!%p168_p3), 0.0   ;;  %v450_v2 = vld [vmem:[%s542_s1 + $0x8] sm:$0xff] (!%p168_p3)   ;;  %vm478_vm0 = vmmov (!%p168_p3), 0   ;;  %p199_p4 = scmp.lt.s32.totalorder (!%p168_p3), %s467_s12, 1  ;;  %vm242_vm1 = vcmask (!%p168_p3), 261120  }
   0x7   : > { %171 = sbr.rel (%p168_p3) target bundleno = 262 (0x106), region = 32  ;;  %415 = vmatprep.subr.bf16.mxu0 (!%p168_p3), %v477_v1  ;;  %419 = vmatprep.mubr.msk.bf16.mxu0 (!%p168_p3), %vm478_vm0, %v477_v1  ;;  %v406_v4 = vld [vmem:[%s543_s2] ss:$0 sm:$0xff] (!%p168_p3)  ;;  %vm296_vm2 = vcmask (!%p168_p3), 519168  }
   0x8   : > { %416 = vmatpush3.bf16.msra.mxu0 (!%p168_p3), %v449_v0 }
   0x9   : > { %417 = vmatprep.subr.bf16.mxu0 (!%p168_p3), %v477_v1 }
   0xc   : > { %418 = vmatpush3.bf16.msra.mxu0 (!%p168_p3), %v450_v2 }
   0xe   : > { %s550_s12 = smov (!%p199_p4, %s467_s12), 1 }
   0xf   : > { %s404_s20 = sshll.u32 %s550_s12, 2 }
  0x10   : > { %s202_s23 = scalar_lea.vmem %s541_s0, %s404_s20  ;;  %s216_s28 = scalar_lea.vmem %s544_s3, %s404_s20 }
  0x11   : > { %v218_v3 = vld [vmem:[%s202_s23] sm:$0xf] }
  0x12   : > { %420 = vmatmul.mubr.msk.bf16.vlgmr.msra.gmra.mrb[0].mxu0 %vm242_vm1, %v218_v3 }
  0xe5   : > { %v280_v5 = vpop.f32.mrb[0].mxu0 }
  0xe6   : > { %v281_v6 = vadd.f32 %v406_v4, %v280_v5  ;;  %v421_v7 = vpop.f32.mrb[1].mxu0 }
  0xe7   : > { %v283_v8 = vpop.f32.mrb[2].mxu0 }
  0xe8   : > { %v286_v9 = vmul.f32 %v281_v6, %v281_v6  ;;  %v422_v10 = vpop.f32.mrb[3].mxu0 }
  0xea   : > { %v287_v11 = vmul.f32 %v286_v9, %v281_v6 }
  0xec   : > { %v288_v12 = vmul.f32 0.044715, %v287_v11 }
  0xee   : > { %v289_v13 = vadd.f32 %v288_v12, %v281_v6 }
  0xf0   : > { %v290_v14 = vmul.f32 0.7978846, %v289_v13 }
  0xf2   : > { %451 = vtanh.f32 %v290_v14 }
  0xfc   : > { %v452_v15 = vpop.eup %451 }
  0xfd   : > { %v292_v16 = vadd.f32 1.0, %v452_v15 }
  0xff   : > { %v293_v17 = vmul.f32 0.5, %v292_v16 }
 0x101   : > { %v294_v18 = vmul.f32 %v293_v17, %v281_v6 }
 0x103   : > { %v295_v19 = vpack.c.bf16 %v294_v18, %v294_v18 }
 0x105   : > { %297 = vst.msk [vmem:[%s216_s28] sm:$0xf] %vm296_vm2, %v295_v19 }
 0x106 PF: > { %s13_s14 = sadd.s32 1, %s475_s14   ;;  %s545_s12 = smov %s471_s13 }
 0x107   : > { %p10_p5 = scmp.ge.s32.totalorder %s13_s14, 4   ;;  %s546_s13 = smov %s548_s15 }
 0x109   :  { %12 = sbr.rel (!%p10_p5) target bundleno = 2 (0x2), region = 68 }

// kernel: forward.23
= control target key start
LH: loop header
LB: loop body
LE: loop exit
PB: predicated region body
PF: predicated region fallthrough
CT: control target
= control target key end

     0   :  { %s275_s14 = smov 0   ;;  %s300_s0 = inlined_call_operand.vmem [shape: bf16[2,8,32], index: 0, kind: input, shape index: {}]   ;;  %s301_s1 = inlined_call_operand.vmem [shape: f32[1,64], index: 1, kind: input, shape index: {}]   ;;  %s302_s2 = inlined_call_operand.<no memory space> [shape: f32[1,1], index: 2, kind: input, shape index: {}]   ;;  %s303_s3 = inlined_call_operand.vmem [shape: f32[2,1], index: 3, kind: output, shape index: {}]  }
   0x1   :  { %v8_v0 = vstv %s302_s2 }
   0x2   :  { %9 = vst [vmem:[#allocation2] sm:$0x1] %v8_v0 }
   0x3 LB: > { %s281_s15 = sadd.s32 4294967295, %s249_s14   ;;  %p230_p0 = scmp.ge.s32.totalorder %s249_s14, 1  ;;  %s249_s14 = sphi %s275_s14, %s15_s14  }
   0x4   : > { %p133_p1 = scmp.lt.s32.totalorder %s249_s14, 3 }
   0x6   : > { %p134_p2 = pnand %p230_p0, %p133_p1 }
   0x7   : > { %v181_v1 = vlaneseq (!%p134_p2)  ;;  %p151_p3 = scmp.lt.s32.totalorder (!%p134_p2), %s281_s15, 1  ;;  %v174_v3 = vld [vmem:[%s301_s1] sm:$0x1] (!%p134_p2)  ;;  %vm157_vm0 = vcmask (!%p134_p2), 261120   ;;  %s251_s22 = smov (!%p134_p2), 96   ;;  %vm176_vm1 = vcmask (!%p134_p2), 253952  }
   0x8   : > { %137 = sbr.rel (%p134_p2) target bundleno = 280 (0x118), region = 32  ;;  %s195_s25 = scalar_lea.vmem (!%p134_p2), %s303_s3, %s281_s15  ;;  %vm196_vm2 = vcmask (!%p134_p2), 0  }
   0x9   : > { %v182_v2 = vshrl.u32 (!%p134_p2), %v181_v1, 7  ;;  %v193_v30 = vld [vmem:[#allocation2] sm:$0x1] (!%p134_p2) }
   0xb   : > { %v183_v4 = vsub.s32 (!%p134_p2), 0, %v182_v2 }
   0xd   : > { %v184_v5 = vrot.slane (!%p134_p2), %v174_v3, %v183_v4 }
   0xf   : > { %s152_s2 = scalar_select %p151_p3, %s281_s15, 1  ;;  %185 = vrot.lane.b32.xlu0 %v184_v5, %s251_s22 }
  0x11   : > { %s231_s18 = sshll.u32 %s152_s2, 2 }
  0x12   : > { %s154_s21 = scalar_lea.vmem %s300_s0, %s231_s18 }
  0x13   : > { %v155_v6 = vld [vmem:[%s154_s21] sm:$0xf] }
  0x14   : > { %v156_v7 = vunpack.c.l.bf16 %v155_v6 }
  0x16   : > { %v158_v8 = vsel %vm157_vm0, %v156_v7, 0.0  ;;  %v167_v9 = vsel %vm157_vm0, %v156_v7, -inf }
  0x17   : > { %v159_v10 = vrot.slane %v158_v8, 4  ;;  %v168_v19 = vrot.slane %v167_v9, 4 }
  0x19   : > { %v160_v11 = vadd.f32 %v159_v10, %v158_v8  ;;  %v169_v20 = vmax.f32 %v167_v9, %v168_v19 }
  0x1b   : > { %v161_v12 = vrot.slane %v160_v11, 2  ;;  %v170_v21 = vrot.slane %v169_v20, 2 }
  0x1d   : > { %v162_v13 = vadd.f32 %v161_v12, %v160_v11  ;;  %v171_v22 = vmax.f32 %v169_v20, %v170_v21 }
  0x1f   : > { %v163_v14 = vrot.slane %v162_v13, 1  ;;  %v172_v23 = vrot.slane %v171_v22, 1 }
  0x21   : > { %v164_v15 = vadd.f32 %v163_v14, %v162_v13  ;;  %v173_v24 = vmax.f32 %v171_v22, %v172_v23 }
  0x23   : > { %v166_v16 = vmul.f32 0.125, %v164_v15 }
  0x25   : > { %v175_v17 = vmul.f32 %v174_v3, %v166_v16 }
  0x27   : > { %v177_v18 = vsel %vm176_vm1, %v175_v17, 0.0 }
  0x2e   : > { %178 = vadd.xlane.f32.xlu0 %v177_v18 }
  0x81   : > { %v186_v25 = vpop.permute.xlu0 %185 }
  0x82   : > { %v188_v26 = vmul.f32 %v186_v25, %v173_v24 }
  0x84   : > { %v189_v27 = vsel %vm176_vm1, %v188_v26, 0.0 }
  0x85   : > { %190 = vadd.xlane.f32.xlu1 %v189_v27 }
  0xbb   : > { %v179_v28 = vpop.xlane.xlu0 %178 }
 0x112   : > { %v191_v29 = vpop.xlane.xlu1 %190 }
 0x113   : > { %v192_v31 = vadd.f32 %v191_v29, %v179_v28 }
 0x115   : > { %v194_v32 = vadd.f32 %v193_v30, %v192_v31 }
 0x117   : > { %197 = vst.msk [vmem:[%s195_s25] sm:$0x1] %vm196_vm2, %v194_v32 }
 0x118 PF: > { %s15_s14 = sadd.s32 1, %s249_s14  }
 0x119   : > { %p12_p4 = scmp.ge.s32.totalorder %s15_s14, 4  }
 0x11b   :  { %14 = sbr.rel (!%p12_p4) target bundleno = 3 (0x3), region = 59 }

// kernel: forward.17
= control target key start
LH: loop header
LB: loop body
LE: loop exit
PB: predicated region body
PF: predicated region fallthrough
CT: control target
= control target key end

     0   :  { %s547_s21 = smov 0   ;;  %s593_s0 = inlined_call_operand.vmem [shape: bf16[16,64], index: 0, kind: input, shape index: {}]   ;;  %s594_s1 = inlined_call_operand.vmem [shape: bf16[64,32], index: 1, kind: input, shape index: {}]   ;;  %s595_s2 = inlined_call_operand.vmem [shape: f32[1,32], index: 2, kind: input, shape index: {}]   ;;  %s596_s3 = inlined_call_operand.vmem [shape: bf16[16,32], index: 3, kind: input, shape index: {}]   ;;  %s597_s4 = inlined_call_operand.vmem [shape: f32[1,32], index: 4, kind: input, shape index: {}]   ;;  %s598_s5 = inlined_call_operand.vmem [shape: f32[1,32], index: 5, kind: input, shape index: {}]   ;;  %s599_s6 = inlined_call_operand.vmem [shape: bf16[16,32], index: 6, kind: output, shape index: {}]  }
   0x1 LB: > { %s451_s22 = sadd.s32 4294967295, %s508_s21   ;;  %p455_p0 = scmp.ge.s32.totalorder %s508_s21, 1  ;;  %s508_s21 = sphi %s547_s21, %s16_s21  }
   0x2   : > { %p220_p1 = scmp.lt.s32.totalorder %s508_s21, 3 }
   0x4   : > { %p221_p2 = pnand %p455_p0, %p220_p1 }
   0x5   : > { %v496_v0 = vld [vmem:[%s594_s1] sm:$0xff] (!%p221_p2)   ;;  %v510_v1 = vmov (!%p221_p2), 0.0   ;;  %v497_v2 = vld [vmem:[%s594_s1 + $0x8] sm:$0xff] (!%p221_p2)   ;;  %vm511_vm0 = vmmov (!%p221_p2), 0   ;;  %p252_p3 = scmp.lt.s32.totalorder (!%p221_p2), %s451_s22, 1  ;;  %v498_v3 = vld [vmem:[%s594_s1 + $0x10] sm:$0xff] (!%p221_p2)  }
   0x6   : > { %224 = sbr.rel (%p221_p2) target bundleno = 554 (0x22a), region = 44  ;;  %474 = vmatprep.subr.bf16.mxu0 (!%p221_p2), %v510_v1  ;;  %482 = vmatprep.mubr.msk.bf16.mxu0 (!%p221_p2), %vm511_vm0, %v510_v1  ;;  %v499_v4 = vld [vmem:[%s594_s1 + $0x18] sm:$0xff] (!%p221_p2)   ;;  %vm305_vm1 = vcmask (!%p221_p2), 523264   ;;  %v459_v7 = vld [vmem:[%s595_s2] ss:$0 sm:$0xff] (!%p221_p2)  ;;  %vm352_vm2 = vcmask (!%p221_p2), 261120  }
   0x7   : > { %475 = vmatpush3.bf16.msra.mxu0 (!%p221_p2), %v496_v0  ;;  %v465_v25 = vld [vmem:[%s597_s4] ss:$0 sm:$0xff] (!%p221_p2)  ;;  %vm384_vm3 = vcmask (!%p221_p2), 257024  }
   0x8   : > { %476 = vmatprep.subr.bf16.mxu0 (!%p221_p2), %v510_v1  ;;  %v466_v27 = vld [vmem:[%s598_s5] ss:$0 sm:$0xff] (!%p221_p2) }
   0xb   : > { %477 = vmatpush3.bf16.msra.mxu0 (!%p221_p2), %v497_v2 }
   0xc   : > { %478 = vmatprep.subr.bf16.mxu0 (!%p221_p2), %v510_v1 }
   0xd   : > { %s601_s22 = smov (!%p252_p3, %s451_s22), 1 }
   0xe   : > { %s564_s29 = sshll.u32 %s601_s22, 2 }
   0xf   : > { %479 = vmatpush3.bf16.msra.mxu0 %v498_v3  ;;  %s255_s10 = scalar_lea.vmem %s593_s0, %s564_s29  ;;  %s259_s13 = scalar_lea.vmem %s596_s3, %s564_s29 }
  0x10   : > { %480 = vmatprep.subr.bf16.mxu0 %v510_v1  ;;  %v265_v5 = vld [vmem:[%s255_s10] sm:$0xf]  ;;  %s263_s23 = scalar_lea.vmem %s599_s6, %s564_s29 }
  0x11   : > { %v349_v6 = vld [vmem:[%s259_s13] sm:$0xf] }
  0x12   : > { %v350_v8 = vunpack.c.l.bf16 %v349_v6 }
  0x13   : > { %481 = vmatpush3.bf16.msra.mxu0 %v499_v4 }
  0x16   : > { %483 = vmatmul.mubr.msk.bf16.vlgmr.msra.gmra.mrb[0].mxu0 %vm305_vm1, %v265_v5 }
  0xe9   : > { %v343_v9 = vpop.f32.mrb[0].mxu0 }
  0xea   : > { %v344_v10 = vadd.f32 %v459_v7, %v343_v9  ;;  %v484_v11 = vpop.f32.mrb[1].mxu0 }
  0xeb   : > { %v346_v12 = vpop.f32.mrb[2].mxu0 }
  0xec   : > { %v485_v13 = vpop.f32.mrb[3].mxu0  ;;  %v351_v14 = vadd.f32 %v350_v8, %v344_v10 }
  0xee   : > { %v353_v15 = vsel %vm352_vm2, %v351_v14, 0.0 }
  0xef   : > { %354 = vadd.xlane.f32.xlu0 %v353_v15 }
 0x17c   : > { %v355_v16 = vpop.xlane.xlu0 %354 }
 0x17d   : > { %v357_v17 = vmul.f32 0.03125, %v355_v16 }
 0x17f   : > { %v358_v18 = vsub.f32 %v351_v14, %v357_v17 }
 0x181   : > { %v359_v19 = vmul.f32 %v358_v18, %v358_v18 }
 0x183   : > { %v360_v20 = vsel %vm352_vm2, %v359_v19, 0.0 }
 0x184   : > { %361 = vadd.xlane.f32.xlu0 %v360_v20 }
 0x211   : > { %v362_v21 = vpop.xlane.xlu0 %361 }
 0x212   : > { %v363_v22 = vmul.f32 0.03125, %v362_v21 }
 0x214   : > { %v364_v23 = vadd.f32 1e-12, %v363_v22 }
 0x216   : > { %500 = vrsqrt.f32 %v364_v23 }
 0x220   : > { %v501_v24 = vpop.eup %500 }
 0x221   : > { %v366_v26 = vmul.f32 %v501_v24, %v358_v18 }
 0x223   : > { %v374_v28 = vmul.f32 %v465_v25, %v366_v26 }
 0x225   : > { %v382_v29 = vadd.f32 %v466_v27, %v374_v28 }
 0x227   : > { %v383_v30 = vpack.c.bf16 %v382_v29, %v382_v29 }
 0x229   : > { %385 = vst.msk [vmem:[%s263_s23] sm:$0xf] %vm384_vm3, %v383_v30 }
 0x22a PF: > { %s16_s21 = sadd.s32 1, %s508_s21  }
 0x22b   : > { %p13_p4 = scmp.ge.s32.totalorder %s16_s21, 4  }
 0x22d   :  { %15 = sbr.rel (!%p13_p4) target bundleno = 1 (0x1), region = 77 }

</bundles_post_ra>
